<compile_context>
chip_gen: v6e
topology: v6e:2x2x1
jax: 0.10.0
libtpu: 0.0.40
codegen_flags: <defaults>
</compile_context>

<pallas_src>
import jax
import jax.numpy as jnp
from jax import lax
from jax.experimental import pallas as pl
from jax.experimental.pallas import tpu as pltpu


def _round_up(x, m):
    return ((x + m - 1) // m) * m


# --------------------------------------------------------------------------- #
# Fused chain kernel.
#   grid = (L + 1, n_row_tiles)   (layer axis outer, row-tile axis inner)
#   scratch: w_scr (F_pad, D) p_dtype   — this layer's W
#            m_acc (F_pad, D) f32       — next layer's P^T @ E accumulator
# --------------------------------------------------------------------------- #
def _lcfn_chain_kernel(p_ref, e0_ref, f_ref, t_ref, out_ref, w_scr, m_acc):
    k = pl.program_id(0)               # 0: pass-through E0; 1..L: layer k
    i = pl.program_id(1)               # row-tile index
    n_layers = pl.num_programs(0) - 1

    p = p_ref[...]                     # (tn, F_pad), p_dtype (bf16 by default)

    @pl.when(k == 0)
    def _pass_through_e0():
        @pl.when(i == 0)
        def _init():
            m_acc[...] = jnp.zeros_like(m_acc)

        e0 = e0_ref[...]                                         # (tn, D) f32
        # E0 goes verbatim (f32) into the first output slab.
        out_ref[...] = e0.reshape(out_ref.shape).astype(out_ref.dtype)
        # M_0 += P_tile^T @ E0_tile  ("TN" dim numbers: contract the row dim of
        # both operands on the MXU, no XLU transpose of the tall tile).
        m_acc[...] += lax.dot_general(
            p, e0.astype(p.dtype), (((0,), (0,)), ((), ())),
            preferred_element_type=jnp.float32)

    @pl.when(k > 0)
    def _layer():
        @pl.when(i == 0)
        def _new_layer():
            # W_{k-1} = (f ⊙_rows M) @ T  — tiny (F_pad, D) matmul, once/layer.
            w = jnp.dot(f_ref[0] * m_acc[...], t_ref[0],
                        preferred_element_type=jnp.float32)
            w_scr[...] = w.astype(w_scr.dtype)
            m_acc[...] = jnp.zeros_like(m_acc)

        # E_k tile = sigmoid(P_tile @ W)   (bf16 MXU operands, f32 accumulate).
        e = jax.nn.sigmoid(
            jnp.dot(p, w_scr[...], preferred_element_type=jnp.float32))
        out_ref[...] = e.reshape(out_ref.shape).astype(out_ref.dtype)

        # Fold the next layer's reduction: M_k += P_tile^T @ E_k_tile.
        @pl.when(k < n_layers)
        def _accumulate_next():
            m_acc[...] += lax.dot_general(
                p, e.astype(p.dtype), (((0,), (0,)), ((), ())),
                preferred_element_type=jnp.float32)


# --------------------------------------------------------------------------- #
# Wrappers
# --------------------------------------------------------------------------- #
def lcfn_chain(P, E0, filters, transformers, *, tile_n=1024,
               p_dtype=jnp.bfloat16):
    """All propagation layers for one chain (users or items).

    Returns the concatenated embeddings [E0 | E1 | ... | EL] of shape
    (N, (L+1)*D).
    """
    N, F = P.shape
    D = E0.shape[1]
    L = len(transformers)
    assert L >= 1 and len(filters) == L

    F_pad = _round_up(F, 128)                              # lane-dense contraction dim
    tn = _round_up(max(16, min(tile_n, _round_up(N, 16))), 16)  # bf16 sublane packing
    N_pad = _round_up(N, tn)
    n_tiles = N_pad // tn

    # Zero-padded operands (padded rows/cols contribute exactly zero).
    Pp = (jnp.zeros((N_pad, F_pad), jnp.float32)
          .at[:N, :F].set(P.astype(jnp.float32)).astype(p_dtype))
    E0p = jnp.zeros((N_pad, D), jnp.float32).at[:N, :].set(E0.astype(jnp.float32))

    # Filters as (L, F_pad, 1) columns: the per-row scale broadcasts over the
    # D lanes inside the kernel (once per layer, off the hot loop).
    f_stack = jnp.stack([
        jnp.zeros((F_pad,), jnp.float32)
        .at[:F].set(jnp.asarray(f, jnp.float32).reshape(-1))
        for f in filters])[:, :, None]                              # (L, F_pad, 1)
    t_stack = jnp.stack([jnp.asarray(t, jnp.float32)
                         for t in transformers])                    # (L, D, D)

    # Lane-dense, concatenation-free output layout whenever legal (D % 128 == 0).
    concat_layout = (D % 128 == 0)
    if concat_layout:
        out_shape = jax.ShapeDtypeStruct((N_pad, (L + 1) * D), jnp.float32)
        out_spec = pl.BlockSpec((tn, D), lambda k, i: (i, k))
    else:
        out_shape = jax.ShapeDtypeStruct((L + 1, N_pad, D), jnp.float32)
        out_spec = pl.BlockSpec((1, tn, D), lambda k, i: (k, i, 0))

    out = pl.pallas_call(
        _lcfn_chain_kernel,
        out_shape=out_shape,
        grid=(L + 1, n_tiles),
        in_specs=[
            # P tile — streamed (bf16 by default), re-read once per layer.
            pl.BlockSpec((tn, F_pad), lambda k, i: (i, 0)),
            # E0 tile — only consumed at k == 0; the index map pins it to block
            # 0 for k >= 1 so it is not re-fetched on later layers.
            pl.BlockSpec((tn, D), lambda k, i: (jnp.where(k == 0, i, 0), 0)),
            # Per-layer filter column and transformer (re-fetched only when k
            # changes since the index map ignores i).
            pl.BlockSpec((1, F_pad, 1), lambda k, i: (jnp.maximum(k - 1, 0), 0, 0)),
            pl.BlockSpec((1, D, D), lambda k, i: (jnp.maximum(k - 1, 0), 0, 0)),
        ],
        out_specs=out_spec,
        scratch_shapes=[
            pltpu.VMEM((F_pad, D), p_dtype),       # w_scr (MXU operand dtype)
            pltpu.VMEM((F_pad, D), jnp.float32),   # m_acc (f32 accumulator)
        ],
        # Both axes carry state (W per layer, M accumulator across row tiles).
        # TODO(synk): v7x dual-core split needs per-core partial-M outputs.
        compiler_params=pltpu.CompilerParams(
            dimension_semantics=("arbitrary", "arbitrary")),
    )(Pp, E0p, f_stack, t_stack)

    if concat_layout:
        return out[:N, :]
    # Fallback (D not a multiple of 128): assemble the concatenated layout.
    return out[:, :N, :].transpose(1, 0, 2).reshape(N, (L + 1) * D)


def lcfn_forward(P, Q, user_emb, item_emb, user_filters, item_filters,
                 transformers, *, tile_n=1024, p_dtype=jnp.bfloat16):
    """LCFN.forward(): returns (user_all_embeddings, item_all_embeddings)."""
    user_all = lcfn_chain(P, user_emb, user_filters, transformers,
                          tile_n=tile_n, p_dtype=p_dtype)
    item_all = lcfn_chain(Q, item_emb, item_filters, transformers,
                          tile_n=tile_n, p_dtype=p_dtype)
    return user_all, item_all


# --------------------------------------------------------------------------- #
# Pure-JAX f32 reference (exact torch matmul order)
# --------------------------------------------------------------------------- #
def _ref_chain(P, E0, filters, transformers):
    outs, E = [E0], E0
    for k in range(len(transformers)):
        E = jax.nn.sigmoid(
            ((P * filters[k][None, :]) @ (P.T @ E)) @ transformers[k])
        outs.append(E)
    return jnp.concatenate(outs, axis=1)


# --------------------------------------------------------------------------- #
# Test
# --------------------------------------------------------------------------- #
def _make_inputs(n_users, n_items, emb_dim, freq_user, freq_item, n_layers):
    key = jax.random.PRNGKey(0)
    ks = jax.random.split(key, 7)
    # Graph spectral bases (scaled to keep the toy recursion well-conditioned).
    P = 0.25 * jax.random.normal(ks[0], (n_users, freq_user), dtype=jnp.float32)
    Q = 0.25 * jax.random.normal(ks[1], (n_items, freq_item), dtype=jnp.float32)
    # nn.Embedding weights ~ N(0.01, 0.02).
    user_emb = 0.01 + 0.02 * jax.random.normal(ks[2], (n_users, emb_dim),
                                               dtype=jnp.float32)
    item_emb = 0.01 + 0.02 * jax.random.normal(ks[3], (n_items, emb_dim),
                                               dtype=jnp.float32)
    # Per-layer filters ~ N(1, 0.001).
    user_filters = [1.0 + 0.001 * jax.random.normal(
        jax.random.fold_in(ks[4], k), (freq_user,), dtype=jnp.float32)
        for k in range(n_layers)]
    item_filters = [1.0 + 0.001 * jax.random.normal(
        jax.random.fold_in(ks[5], k), (freq_item,), dtype=jnp.float32)
        for k in range(n_layers)]
    # Per-layer transformers: N(0, 0.001) + diag(N(1, 0.001)).
    transformers = []
    for k in range(n_layers):
        kk = jax.random.fold_in(ks[6], k)
        off = 0.001 * jax.random.normal(kk, (emb_dim, emb_dim), dtype=jnp.float32)
        dia = 1.0 + 0.001 * jax.random.normal(
            jax.random.fold_in(kk, 1), (emb_dim,), dtype=jnp.float32)
        transformers.append(off + jnp.diag(dia))
    return P, Q, user_emb, item_emb, user_filters, item_filters, transformers


def _run_config(n_users, n_items, emb_dim, freq_user, freq_item, n_layers,
                tile_n):
    P, Q, ue, ie, uf, itf, tr = _make_inputs(
        n_users, n_items, emb_dim, freq_user, freq_item, n_layers)
    ref_u = _ref_chain(P, ue, uf, tr)
    ref_i = _ref_chain(Q, ie, itf, tr)
    d_out = emb_dim * (n_layers + 1)

    # f32 kernel run: must match the torch-order reference tightly (only
    # summation order / association differ).
    ua32, ia32 = lcfn_forward(P, Q, ue, ie, uf, itf, tr,
                              tile_n=tile_n, p_dtype=jnp.float32)
    jax.block_until_ready((ua32, ia32))
    assert ua32.shape == (n_users, d_out) and ia32.shape == (n_items, d_out)
    assert jnp.allclose(ua32, ref_u, atol=1e-4, rtol=1e-4)
    assert jnp.allclose(ia32, ref_i, atol=1e-4, rtol=1e-4)

    # bf16-streamed-P run (the default fast path): same indexing/control flow,
    # bf16 MXU operands with f32 accumulation -> loose tolerance vs f32 ref.
    uab, iab = lcfn_forward(P, Q, ue, ie, uf, itf, tr, tile_n=tile_n)
    jax.block_until_ready((uab, iab))
    assert uab.shape == (n_users, d_out) and iab.shape == (n_items, d_out)
    assert bool(jnp.all(jnp.isfinite(uab))) and bool(jnp.all(jnp.isfinite(iab)))
    # E0 pass-through columns are kept in f32 and must be exact.
    assert jnp.allclose(uab[:, :emb_dim], ue, atol=1e-6, rtol=0)
    assert jnp.allclose(iab[:, :emb_dim], ie, atol=1e-6, rtol=0)
    assert jnp.allclose(uab, ref_u, atol=1e-1, rtol=0)
    assert jnp.allclose(iab, ref_i, atol=1e-1, rtol=0)


if __name__ == "__main__":
    # tile_n=32 exercises multi-tile streaming, layer fusion, and N padding
    # (n_items=80 -> 96) at toy shapes; F is padded 16/24 -> 128 in both.
    # Config A: emb_dim=128 -> lane-dense concatenated output layout.
    _run_config(n_users=64, n_items=80, emb_dim=128,
                freq_user=16, freq_item=24, n_layers=2, tile_n=32)
    # Config B: emb_dim=32 -> fallback (L+1, N, D) slab layout.
    _run_config(n_users=64, n_items=80, emb_dim=32,
                freq_user=16, freq_item=24, n_layers=3, tile_n=32)
    print("KERNEL_OK")
</pallas_src>

<mosaic_0001>
module attributes {stable_mosaic.version = 11 : i64} {
  func.func @_lcfn_chain_kernel(%arg0: i32, %arg1: i32, %arg2: memref<32x128xf32, #tpu.memory_space<vmem>>, %arg3: memref<32x128xf32, #tpu.memory_space<vmem>>, %arg4: memref<1x128x1xf32, #tpu.memory_space<vmem>>, %arg5: memref<1x128x128xf32, #tpu.memory_space<vmem>>, %arg6: memref<32x128xf32, #tpu.memory_space<vmem>>, %arg7: memref<128x128xf32, #tpu.memory_space<vmem>>, %arg8: memref<128x128xf32, #tpu.memory_space<vmem>>) attributes {dimension_semantics = [#tpu.dimension_semantics<arbitrary>, #tpu.dimension_semantics<arbitrary>], iteration_bounds = array<i64: 3, 2>, scalar_prefetch = 0 : i64, scratch_operands = 2 : i64, tpu.core_type = #tpu.core_type<tc>, window_params = [{transform_indices = @transform_0, window_bounds = array<i64: 32, 128>}, {transform_indices = @transform_1, window_bounds = array<i64: 32, 128>}, {transform_indices = @transform_2, window_bounds = array<i64: 1, 128, 1>}, {transform_indices = @transform_3, window_bounds = array<i64: 1, 128, 128>}, {transform_indices = @transform_4, window_bounds = array<i64: 32, 128>}]} {
    %c0 = arith.constant 0 : index
    %c0_0 = arith.constant 0 : index
    %0 = vector.load %arg2[%c0, %c0_0] : memref<32x128xf32, #tpu.memory_space<vmem>>, vector<32x128xf32>
    %c0_i32 = arith.constant 0 : i32
    %1 = arith.cmpi eq, %arg0, %c0_i32 : i32
    %2 = arith.extui %1 : i1 to i32
    %c0_i32_1 = arith.constant 0 : i32
    %3 = arith.cmpi ne, %2, %c0_i32_1 : i32
    scf.if %3 {
      %c0_i32_4 = arith.constant 0 : i32
      %7 = arith.cmpi eq, %arg1, %c0_i32_4 : i32
      %8 = arith.extui %7 : i1 to i32
      %c0_i32_5 = arith.constant 0 : i32
      %9 = arith.cmpi ne, %8, %c0_i32_5 : i32
      scf.if %9 {
        %cst_14 = arith.constant 0.000000e+00 : f32
        %16 = vector.broadcast %cst_14 : f32 to vector<128x128xf32>
        %c0_15 = arith.constant 0 : index
        %c0_16 = arith.constant 0 : index
        %17 = vector.load %arg8[%c0_15, %c0_16] : memref<128x128xf32, #tpu.memory_space<vmem>>, vector<128x128xf32>
        tpu.vector_store %arg8[%c0_15, %c0_16], %16 {strides = array<i32>} : memref<128x128xf32, #tpu.memory_space<vmem>>, vector<128x128xf32>,
      } else {
      }
      %c0_6 = arith.constant 0 : index
      %c0_7 = arith.constant 0 : index
      %10 = vector.load %arg3[%c0_6, %c0_7] : memref<32x128xf32, #tpu.memory_space<vmem>>, vector<32x128xf32>
      %c0_8 = arith.constant 0 : index
      %c0_9 = arith.constant 0 : index
      %11 = vector.load %arg6[%c0_8, %c0_9] : memref<32x128xf32, #tpu.memory_space<vmem>>, vector<32x128xf32>
      tpu.vector_store %arg6[%c0_8, %c0_9], %10 {strides = array<i32>} : memref<32x128xf32, #tpu.memory_space<vmem>>, vector<32x128xf32>,
      %c0_10 = arith.constant 0 : index
      %c0_11 = arith.constant 0 : index
      %12 = vector.load %arg8[%c0_10, %c0_11] : memref<128x128xf32, #tpu.memory_space<vmem>>, vector<128x128xf32>
      %cst = arith.constant dense<0.000000e+00> : vector<128x128xf32>
      %13 = tpu.matmul %0, %10, %cst {dimension_numbers = #tpu.dot_dimension_numbers<[0], [0], [1], [1], [0, 1, 1, 1], [], []>} : vector<32x128xf32>, vector<32x128xf32>, vector<128x128xf32> -> vector<128x128xf32>
      %14 = arith.addf %12, %13 : vector<128x128xf32>
      %c0_12 = arith.constant 0 : index
      %c0_13 = arith.constant 0 : index
      %15 = vector.load %arg8[%c0_12, %c0_13] : memref<128x128xf32, #tpu.memory_space<vmem>>, vector<128x128xf32>
      tpu.vector_store %arg8[%c0_12, %c0_13], %14 {strides = array<i32>} : memref<128x128xf32, #tpu.memory_space<vmem>>, vector<128x128xf32>,
    } else {
    }
    %c0_i32_2 = arith.constant 0 : i32
    %4 = arith.cmpi sgt, %arg0, %c0_i32_2 : i32
    %5 = arith.extui %4 : i1 to i32
    %c0_i32_3 = arith.constant 0 : i32
    %6 = arith.cmpi ne, %5, %c0_i32_3 : i32
    scf.if %6 {
      %c0_i32_4 = arith.constant 0 : i32
      %7 = arith.cmpi eq, %arg1, %c0_i32_4 : i32
      %8 = arith.extui %7 : i1 to i32
      %c0_i32_5 = arith.constant 0 : i32
      %9 = arith.cmpi ne, %8, %c0_i32_5 : i32
      scf.if %9 {
        %c0_12 = arith.constant 0 : index
        %c0_13 = arith.constant 0 : index
        %c0_14 = arith.constant 0 : index
        %21 = vector.load %arg4[%c0_12, %c0_13, %c0_14] : memref<1x128x1xf32, #tpu.memory_space<vmem>>, vector<1x128x1xf32>
        %22 = vector.shape_cast %21 : vector<1x128x1xf32> to vector<128x1xf32>
        %c0_15 = arith.constant 0 : index
        %c0_16 = arith.constant 0 : index
        %23 = vector.load %arg8[%c0_15, %c0_16] : memref<128x128xf32, #tpu.memory_space<vmem>>, vector<128x128xf32>
        %24 = vector.broadcast %22 : vector<128x1xf32> to vector<128x128xf32>
        %25 = arith.mulf %24, %23 : vector<128x128xf32>
        %c0_17 = arith.constant 0 : index
        %c0_18 = arith.constant 0 : index
        %c0_19 = arith.constant 0 : index
        %26 = vector.load %arg5[%c0_17, %c0_18, %c0_19] : memref<1x128x128xf32, #tpu.memory_space<vmem>>, vector<1x128x128xf32>
        %27 = vector.shape_cast %26 : vector<1x128x128xf32> to vector<128x128xf32>
        %cst_20 = arith.constant dense<0.000000e+00> : vector<128x128xf32>
        %28 = tpu.matmul %25, %27, %cst_20 {dimension_numbers = #tpu.dot_dimension_numbers<[1], [0], [0], [1], [0, 0, 1, 1], [], []>} : vector<128x128xf32>, vector<128x128xf32>, vector<128x128xf32> -> vector<128x128xf32>
        %c0_21 = arith.constant 0 : index
        %c0_22 = arith.constant 0 : index
        %29 = vector.load %arg7[%c0_21, %c0_22] : memref<128x128xf32, #tpu.memory_space<vmem>>, vector<128x128xf32>
        tpu.vector_store %arg7[%c0_21, %c0_22], %28 {strides = array<i32>} : memref<128x128xf32, #tpu.memory_space<vmem>>, vector<128x128xf32>,
        %cst_23 = arith.constant 0.000000e+00 : f32
        %30 = vector.broadcast %cst_23 : f32 to vector<128x128xf32>
        %c0_24 = arith.constant 0 : index
        %c0_25 = arith.constant 0 : index
        %31 = vector.load %arg8[%c0_24, %c0_25] : memref<128x128xf32, #tpu.memory_space<vmem>>, vector<128x128xf32>
        tpu.vector_store %arg8[%c0_24, %c0_25], %30 {strides = array<i32>} : memref<128x128xf32, #tpu.memory_space<vmem>>, vector<128x128xf32>,
      } else {
      }
      %c0_6 = arith.constant 0 : index
      %c0_7 = arith.constant 0 : index
      %10 = vector.load %arg7[%c0_6, %c0_7] : memref<128x128xf32, #tpu.memory_space<vmem>>, vector<128x128xf32>
      %cst = arith.constant dense<0.000000e+00> : vector<32x128xf32>
      %11 = tpu.matmul %0, %10, %cst {dimension_numbers = #tpu.dot_dimension_numbers<[1], [0], [0], [1], [0, 0, 1, 1], [], []>} : vector<32x128xf32>, vector<128x128xf32>, vector<32x128xf32> -> vector<32x128xf32>
      %12 = arith.negf %11 : vector<32x128xf32>
      %13 = math.exp %12 : vector<32x128xf32>
      %cst_8 = arith.constant 1.000000e+00 : f32
      %14 = vector.broadcast %cst_8 : f32 to vector<32x128xf32>
      %15 = arith.addf %14, %13 : vector<32x128xf32>
      %16 = arith.divf %14, %15 : vector<32x128xf32>
      %c0_9 = arith.constant 0 : index
      %c0_10 = arith.constant 0 : index
      %17 = vector.load %arg6[%c0_9, %c0_10] : memref<32x128xf32, #tpu.memory_space<vmem>>, vector<32x128xf32>
      tpu.vector_store %arg6[%c0_9, %c0_10], %16 {strides = array<i32>} : memref<32x128xf32, #tpu.memory_space<vmem>>, vector<32x128xf32>,
      %c2_i32 = arith.constant 2 : i32
      %18 = arith.cmpi slt, %arg0, %c2_i32 : i32
      %19 = arith.extui %18 : i1 to i32
      %c0_i32_11 = arith.constant 0 : i32
      %20 = arith.cmpi ne, %19, %c0_i32_11 : i32
      scf.if %20 {
        %c0_12 = arith.constant 0 : index
        %c0_13 = arith.constant 0 : index
        %21 = vector.load %arg8[%c0_12, %c0_13] : memref<128x128xf32, #tpu.memory_space<vmem>>, vector<128x128xf32>
        %cst_14 = arith.constant dense<0.000000e+00> : vector<128x128xf32>
        %22 = tpu.matmul %0, %16, %cst_14 {dimension_numbers = #tpu.dot_dimension_numbers<[0], [0], [1], [1], [0, 1, 1, 1], [], []>} : vector<32x128xf32>, vector<32x128xf32>, vector<128x128xf32> -> vector<128x128xf32>
        %23 = arith.addf %21, %22 : vector<128x128xf32>
        %c0_15 = arith.constant 0 : index
        %c0_16 = arith.constant 0 : index
        %24 = vector.load %arg8[%c0_15, %c0_16] : memref<128x128xf32, #tpu.memory_space<vmem>>, vector<128x128xf32>
        tpu.vector_store %arg8[%c0_15, %c0_16], %23 {strides = array<i32>} : memref<128x128xf32, #tpu.memory_space<vmem>>, vector<128x128xf32>,
      } else {
      }
    } else {
    }
    return
  }
  func.func @transform_0(%arg0: i32, %arg1: i32) -> (i32, i32) {
    %c0_i32 = arith.constant 0 : i32
    %c0_i32_0 = arith.constant 0 : i32
    return %arg1, %c0_i32 : i32, i32
  }
  func.func @transform_1(%arg0: i32, %arg1: i32) -> (i32, i32) {
    %c0_i32 = arith.constant 0 : i32
    %0 = arith.cmpi eq, %arg0, %c0_i32 : i32
    %c0_i32_0 = arith.constant 0 : i32
    %1 = arith.select %0, %arg1, %c0_i32_0 : i32
    %c0_i32_1 = arith.constant 0 : i32
    %c0_i32_2 = arith.constant 0 : i32
    return %1, %c0_i32_1 : i32, i32
  }
  func.func @transform_2(%arg0: i32, %arg1: i32) -> (i32, i32, i32) {
    %c1_i32 = arith.constant 1 : i32
    %0 = arith.subi %arg0, %c1_i32 : i32
    %c0_i32 = arith.constant 0 : i32
    %1 = arith.maxsi %0, %c0_i32 : i32
    %c0_i32_0 = arith.constant 0 : i32
    %c0_i32_1 = arith.constant 0 : i32
    %c0_i32_2 = arith.constant 0 : i32
    return %1, %c0_i32_0, %c0_i32_1 : i32, i32, i32
  }
  func.func @transform_3(%arg0: i32, %arg1: i32) -> (i32, i32, i32) {
    %c1_i32 = arith.constant 1 : i32
    %0 = arith.subi %arg0, %c1_i32 : i32
    %c0_i32 = arith.constant 0 : i32
    %1 = arith.maxsi %0, %c0_i32 : i32
    %c0_i32_0 = arith.constant 0 : i32
    %c0_i32_1 = arith.constant 0 : i32
    %c0_i32_2 = arith.constant 0 : i32
    return %1, %c0_i32_0, %c0_i32_1 : i32, i32, i32
  }
  func.func @transform_4(%arg0: i32, %arg1: i32) -> (i32, i32) {
    %c0_i32 = arith.constant 0 : i32
    return %arg1, %arg0 : i32, i32
  }
}

</mosaic_0001>

<bundles_post_ra>
// kernel: tpu_custom_call.1
= control target key start
LH: loop header
LB: loop body
LE: loop exit
PB: predicated region body
PF: predicated region fallthrough
CT: control target
= control target key end

     0   :  { %s2866_s0 = inlined_call_operand.hbm [shape: f32[64,128], index: 0, kind: input, shape index: {}]   ;;  %s2867_s1 = inlined_call_operand.hbm [shape: f32[64,128], index: 1, kind: input, shape index: {}]   ;;  %s2868_s2 = inlined_call_operand.vmem [shape: f32[2,128,1], index: 2, kind: input, shape index: {}]   ;;  %s2869_s3 = inlined_call_operand.vmem [shape: f32[2,128,128], index: 3, kind: input, shape index: {}]   ;;  %s2870_s4 = inlined_call_operand.hbm [shape: f32[64,384], index: 4, kind: output, shape index: {}]  }
   0x1   :  { %2884 = sst [smem:[#allocation22_spill]] %s2866_s0 }
   0x2   :  { %2885 = sst [smem:[#allocation23_spill]] %s2868_s2 }
   0x3   :  { %2886 = sst [smem:[#allocation24_spill]] %s2869_s3 }
   0x4   :  { %2887 = sst [smem:[#allocation25_spill]] %s2870_s4 }
   0x5   :  { %9 = vsyncpa [#allocation5], 0 }
   0x6   :  { %11 = vsyncpa [#allocation5 + $0x1], 0 }
   0x7   :  { %12 = vsyncpa [#allocation8], 0 }
   0x8   :  { %14 = vsyncpa [#allocation8 + $0x1], 0 }
   0x9   :  { %15 = vsyncpa [#allocation6], 0 }
   0xa   :  { %17 = vsyncpa [#allocation6 + $0x1], 0  ;;  %s2379_s15 = smov 0   ;;  %s2381_s16 = smov 0  }
   0xb   :  { %s2383_s17 = smov 0   ;;  %s2385_s18 = smov 0  }
   0xc   :  { %s2387_s19 = smov 0   ;;  %s2389_s20 = smov 0  }
   0xd   :  { %s2391_s21 = smov 0   ;;  %s2393_s22 = smov 0  }
   0xe   :  { %s2395_s23 = smov 0   ;;  %s2397_s24 = smov 0  }
   0xf   :  { %s2399_s25 = smov 0   ;;  %s2401_s26 = smov 0  }
  0x10   :  { %s2403_s27 = smov 0   ;;  %s2405_s28 = smov 0  }
  0x11 LB: > { %2888 = sst [smem:[#allocation13_spill]] %s2289_s15  ;;  %s1558_s29 = sadd.s32 4294967295, %s2341_s28   ;;  %s2341_s28 = sphi %s2405_s28, %s23_s28   ;;  %s2337_s27 = sphi %s2403_s27, %s2928_s27   ;;  %s2333_s26 = sphi %s2401_s26, %s2940_s26   ;;  %s2329_s25 = sphi %s2399_s25, %s2939_s25   ;;  %s2325_s24 = sphi %s2397_s24, %s2926_s24   ;;  %s2321_s23 = sphi %s2395_s23, %s2938_s23   ;;  %s2317_s22 = sphi %s2393_s22, %s2937_s22   ;;  %s2313_s21 = sphi %s2391_s21, %s2936_s21   ;;  %s2309_s20 = sphi %s2389_s20, %s2935_s20   ;;  %s2305_s19 = sphi %s2387_s19, %s2934_s19   ;;  %s2301_s18 = sphi %s2385_s18, %s2933_s18   ;;  %s2297_s17 = sphi %s2383_s17, %s2932_s17   ;;  %s2293_s16 = sphi %s2381_s16, %s2931_s16   ;;  %s2289_s15 = sphi %s2379_s15, %s2930_s15  }
  0x12   : > { %2889 = sst [smem:[#allocation14_spill]] %s2321_s23  ;;  %s1559_s30 = sadd.s32 4294967294, %s2341_s28  }
  0x13   : > { %2890 = sst [smem:[#allocation15_spill]] %s2325_s24  ;;  %s32_s5 = sadd.s32 1, %s2333_s26 }
  0x14   : > { %2891 = sst [smem:[#allocation16_spill]] %s2333_s26  ;;  %s42_s6 = sadd.s32 1, %s2321_s23 }
  0x15   : > { %2892 = sst [smem:[#allocation17_spill]] %s2337_s27  ;;  %p2451_p0 = scmp.ge.s32.totalorder %s32_s5, 2 }
  0x16   : > { %p49_p1 = scmp.ne.s32.totalorder %s2321_s23, %s2317_s22  ;;  %p2874_p2 = scmp.eq.s32.totalorder %s2341_s28, 0 }
  0x17   : > { %p55_p3 = scmp.ne.s32.totalorder %s2317_s22, %s2313_s21  ;;  %s2942_s5 = smov (%p2451_p0, %s32_s5), 0 }
  0x18   : > { %p2465_p4 = por %p2874_p2, %p49_p1  ;;  %p2469_p5 = scmp.eq.s32.totalorder %s1558_s29, 0 }
  0x19   : > { %s2475_s10 = ssub.s32 %s2333_s26, %s2942_s5  ;;  %p174_p6 = scmp.ne.s32.totalorder %s2297_s17, %s2293_s16 }
  0x1a   : > { %p40_p7 = scmp.eq.s32.totalorder %s2475_s10, 0  ;;  %p2482_p8 = por %p2469_p5, %p55_p3 }
  0x1b   : > { %p175_p9 = scmp.eq.s32.totalorder %s1558_s29, 5  ;;  %p180_p10 = scmp.ne.s32.totalorder %s2293_s16, %s2289_s15 }
  0x1c   : > { %s2489_s12 = scalar_select %p40_p7, %s2321_s23, %s42_s6  }
  0x1d   : > { %p2491_p11 = por %p175_p9, %p174_p6  ;;  %p181_p12 = scmp.eq.s32.totalorder %s1559_s30, 5 }
  0x1e   : > { %2897 = sst [smem:[#allocation18_spill]] %s2489_s12  ;;  %p1995_p13 = scmp.lt.s32.totalorder %s2341_s28, 6 }
  0x1f   : > { %s2898_s13 = scalar_select %p2491_p11, 1, 0 }
  0x20   : > { %p2496_p1 = por %p181_p12, %p180_p10  ;;  %s201_s21 = sand.u32 1, %s2321_s23  }
  0x21   : > { %2899 = sst [smem:[#allocation19_spill]] %s2898_s13  ;;  %s1566_s4 = sshll.u32 %s201_s21, 5 }
  0x22   : > { %s2900_s14 = scalar_select %p2496_p1, 1, 0 }
  0x23   : > { %s1639_s24 = sshll.u32 %s2333_s26, 9  ;;  %s2902_s0 = sld [smem:[#allocation22_spill]] }
  0x24   : > { %2901 = sst [smem:[#allocation20_spill]] %s2900_s14  ;;  %s205_s15 = scalar_lea.vmem [#allocation4], %s1566_s4 }
  0x25   : > { %s212_s6 = sshll.u32 %s205_s15, 4  ;;  %p2509_p3 = pnand %p1995_p13, %p2465_p4  ;;  %s213_s6 = int_to_ptr.vmem [resolvable:$true] %s212_s6 }
  0x26   : > { %p1572_p6 = scmp.ge.s32.totalorder %s2341_s28, 1  ;;  %s202_s30 = scalar_lea.sflag [#allocation5], %s201_s21 }
  0x27   : > { %p2139_p7 = pneg %p2509_p3  ;;  %s2150_s23 = scalar_lea.vmem %s213_s6, 512 }
  0x28   : > { %p2151_p9 = scmp.ne.s32.totalorder %s213_s6, %s2150_s23  ;;  %s2343_s2 = smov [#allocation4]  }
  0x29   : > { %s211_s29 = scalar_lea.hbm %s2902_s0, %s1639_s24  ;;  %s2155_s3 = sshll.u32 %s2343_s2, 4  ;;  %s2156_s3 = int_to_ptr.vmem [resolvable:$false] %s2155_s3 }
  0x2a   : > { %p2153_p10 = pnand %p2151_p9, %p2139_p7  ;;  %s2157_s4 = scalar_lea.vmem %s2156_s3, 1024 }
  0x2b   : > { %p2158_p2 = scmp.lt.s32.totalorder %s213_s6, %s2156_s3  ;;  %p2159_p1 = scmp.lt.s32.totalorder %s2157_s4, %s2150_s23 }
  0x2c   : > { %p2154_p12 = pneg %p2153_p10 }
  0x2d   : > { %p2160_p11 = por %p2159_p1, %p2158_p2 }
  0x2f   : > { %p2161_p4 = pnand %p2160_p11, %p2154_p12 }
  0x31   : > { %2164 = shalt.err (!%p2161_p4)
}
  0x32   : > { %s2876_s15 = smov 128   ;;  %s2877_s23 = smov 8  }
  0x33   : > { %1987 = dma.hbm_to_vmem [thread:$0]  (!%p2509_p3), %s211_s29, 512, %s213_s6, %s202_s30, %s2876_s15, %s2876_s15, %s2877_s23  }
  0x34   : > { %p271_p2 = scmp.lt.s32.totalorder %s2341_s28, 7  ;;  %s35_s8 = sadd.s32 1, %s2337_s27 }
  0x35   : > { %p65_p1 = scmp.eq.s32.totalorder %s2337_s27, 0  ;;  %s2944_s8 = smov (!%p2451_p0, %s35_s8), %s2337_s27 }
  0x36   : > { %p2524_p11 = pnand %p1572_p6, %p271_p2  ;;  %p37_p7 = scmp.ge.s32.totalorder %s2944_s8, 3 }
  0x37   : > { %s66_s12 = scalar_select %p65_p1, %s2333_s26, 0 }
  0x38   : > { %s72_s21 = sadd.s32 1, %s2309_s20  ;;  %p79_p9 = scmp.ne.s32.totalorder %s2309_s20, %s2305_s19 }
  0x39   : > { %p85_p3 = scmp.ne.s32.totalorder %s2305_s19, %s2301_s18  ;;  %s2946_s8 = smov (%p37_p7, %s2944_s8), 0 }
  0x3a   : > { %2905 = sst [smem:[#allocation21_spill]] %s2946_s8  ;;  %p2906_p10 = scmp.eq.s32.totalorder %s2341_s28, 0 }
  0x3b   : > { %p2549_p12 = por %p85_p3, %p2469_p5  ;;  %p67_p0 = scmp.eq.s32.totalorder %s2946_s8, 0 }
  0x3c   : > { %p2543_p6 = por %p79_p9, %p2906_p10  ;;  %s160_s6 = ssub.s32 %s2337_s27, %s2946_s8 }
  0x3d   : > { %s161_s30 = sor.u32 %s160_s6, %s2475_s10  ;;  %s164_s18 = sadd.s32 1, %s2297_s17 }
  0x3e   : > { %s68_s2 = scalar_select %p67_p0, %s2942_s5, 0 }
  0x3f   : > { %p162_p4 = scmp.eq.s32.totalorder %s161_s30, 0  ;;  %s222_s3 = sand.u32 1, %s2309_s20  }
  0x40   : > { %s69_s4 = ssub.s32 %s66_s12, %s68_s2  ;;  %s1569_s15 = sshll.u32 %s222_s3, 5 }
  0x41   : > { %p70_p2 = scmp.eq.s32.totalorder %s69_s4, 0  ;;  %s1640_s9 = sshll.u32 %s66_s12, 9 }
  0x42   : > { %s2561_s23 = scalar_select %p162_p4, %s2297_s17, %s164_s18  }
  0x43   : > { %s2564_s0 = scalar_select %p70_p2, %s2309_s20, %s72_s21  }
  0x44   : > { %s234_s13 = scalar_lea.hbm %s2867_s1, %s1640_s9  ;;  %s226_s8 = scalar_lea.vmem [#allocation7], %s1569_s15 }
  0x45   : > { %s235_s27 = sshll.u32 %s226_s8, 4  ;;  %p2573_p5 = pnand %p1995_p13, %p2543_p6  ;;  %s236_s27 = int_to_ptr.vmem [resolvable:$true] %s235_s27 }
  0x46   : > { %s223_s6 = scalar_lea.sflag [#allocation8], %s222_s3  ;;  %s2178_s21 = scalar_lea.vmem %s236_s27, 512 }
  0x47   : > { %p2167_p1 = pneg %p2573_p5  ;;  %p2179_p7 = scmp.ne.s32.totalorder %s236_s27, %s2178_s21 }
  0x48   : > { %s2346_s12 = smov [#allocation7]  }
  0x49   : > { %p2181_p9 = pnand %p2179_p7, %p2167_p1  ;;  %s2183_s26 = sshll.u32 %s2346_s12, 4  ;;  %s2184_s26 = int_to_ptr.vmem [resolvable:$false] %s2183_s26 }
  0x4a   : > { %s2185_s14 = scalar_lea.vmem %s2184_s26, 1024  ;;  %p2186_p10 = scmp.lt.s32.totalorder %s236_s27, %s2184_s26 }
  0x4b   : > { %p2182_p3 = pneg %p2181_p9  ;;  %p2187_p0 = scmp.lt.s32.totalorder %s2185_s14, %s2178_s21 }
  0x4d   : > { %p2188_p4 = por %p2187_p0, %p2186_p10 }
  0x4f   : > { %p2189_p2 = pnand %p2188_p4, %p2182_p3 }
  0x51   : > { %2192 = shalt.err (!%p2189_p2)
}
  0x52   : > { %s2910_s15 = smov 8   ;;  %s2911_s8 = smov 128  }
  0x53   : > { %1990 = dma.hbm_to_vmem [thread:$0]  (!%p2573_p5), %s234_s13, 512, %s236_s27, %s223_s6, %s2911_s8, %s2911_s8, %s2910_s15  }
  0x54   : > { %275 = sbr.rel (%p2524_p11) target bundleno = 1552 (0x610), region = 36  ;;  %s277_s29 = sand.u32 (!%p2524_p11), 1, %s2317_s22  }
  0x55   : > { %s1573_s30 = sshll.u32 (!%p2524_p11), %s277_s29, 5  ;;  %s278_s18 = scalar_lea.sflag (!%p2524_p11), [#allocation5], %s277_s29 }
  0x56   : > { %s281_s2 = scalar_lea.vmem (!%p2524_p11), [#allocation4], %s1573_s30 }
  0x59   : > { %2276 = dma.done.wait (%p2482_p8), %s278_s18, 512  }
  0x5a   : > { %2278 = vsyncadd (%p2482_p8), %s278_s18, 4294966784  ;;  %s286_s3 = sand.u32 1, %s2305_s19  }
  0x5b   : > { %s1574_s4 = sshll.u32 %s286_s3, 5  ;;  %s287_s9 = scalar_lea.sflag [#allocation8], %s286_s3 }
  0x5c   : > { %s2592_s27 = scalar_lea.vmem [#allocation7], %s1574_s4 }
  0x5d   : > { %2280 = dma.done.wait (%p2549_p12), %s287_s9, 512  }
  0x5e   : > { %2282 = vsyncadd (%p2549_p12), %s287_s9, 4294966784  ;;  %s333_s13 = sand.u32 1, %s2293_s16   ;;  %s1576_s24 = sadd.s32 4294967295, %s2329_s25  ;;  %v2602_v0 = vld [vmem:[%s281_s2] sm:$0xff]  ;;  %v2604_v1 = vld [vmem:[%s281_s2 + $0x8] sm:$0xff] }
  0x5f   : > { %s1575_s11 = sshll.u32 %s333_s13, 5  ;;  %p341_p8 = scmp.gt.s32.totalorder %s1576_s24, 0  ;;  %v2606_v2 = vld [vmem:[%s281_s2 + $0x10] sm:$0xff]  ;;  %v2608_v3 = vld [vmem:[%s281_s2 + $0x18] sm:$0xff] }
  0x60   : > { %p1577_p13 = scmp.lt.s32.totalorder %s1576_s24, 1  ;;  %s2912_s21 = sld [smem:[#allocation23_spill]] }
  0x61   : > { %s2948_s24 = smov (!%p341_p8, %s1576_s24), 0  ;;  %s2913_s15 = sld [smem:[#allocation24_spill]] }
  0x62   : > { %s2950_s24 = smov (!%p1577_p13, %s2948_s24), 1  ;;  %s2620_s29 = scalar_lea.vmem [#allocation9], %s1575_s11 }
  0x63   : > { %s1643_s10 = sshll.u32 %s2950_s24, 7  ;;  %p1592_p11 = scmp.ne.s32.totalorder %s2329_s25, 0 }
  0x64   : > { %s2914_s30 = sld [smem:[#allocation15_spill]] (!%p1592_p11) }
  0x65   : > { %370 = sbr.rel (%p1592_p11) target bundleno = 505 (0x1f9), region = 48 }
  0x66   : > { %s2613_s12 = scalar_lea.vmem %s2912_s21, %s1643_s10 }
  0x67   : > { %s2618_s8 = scalar_lea.vmem %s2913_s15, %s1643_s10 }
  0x6a   : > { %p1593_p6 = scmp.ne.s32.totalorder %s2914_s30, 0 }
  0x6c   : > { %374 = sbr.rel (%p1593_p6) target bundleno = 122 (0x7a), region = 52 }
  0x71   : > { %v2347_v4 = vmov 0.0  }
  0x72   : > { %375 = vst [vmem:[#allocation3 + $0x28] sm:$0xff] %v2347_v4  ;;  %376 = vst [vmem:[#allocation3 + $0x68] sm:$0xff] %v2347_v4 }
  0x73   : > { %377 = vst [vmem:[#allocation3 + $0x10] sm:$0xff] %v2347_v4  ;;  %378 = vst [vmem:[#allocation3 + $0x40] sm:$0xff] %v2347_v4 }
  0x74   : > { %379 = vst [vmem:[#allocation3 + $0x48] sm:$0xff] %v2347_v4  ;;  %380 = vst [vmem:[#allocation3 + $0x30] sm:$0xff] %v2347_v4 }
  0x75   : > { %381 = vst [vmem:[#allocation3 + $0x70] sm:$0xff] %v2347_v4  ;;  %382 = vst [vmem:[#allocation3 + $0x38] sm:$0xff] %v2347_v4 }
  0x76   : > { %383 = vst [vmem:[#allocation3 + $0x20] sm:$0xff] %v2347_v4  ;;  %384 = vst [vmem:[#allocation3 + $0x78] sm:$0xff] %v2347_v4 }
  0x77   : > { %385 = vst [vmem:[#allocation3 + $0x18] sm:$0xff] %v2347_v4  ;;  %386 = vst [vmem:[#allocation3 + $0x58] sm:$0xff] %v2347_v4 }
  0x78   : > { %387 = vst [vmem:[#allocation3] sm:$0xff] %v2347_v4  ;;  %388 = vst [vmem:[#allocation3 + $0x8] sm:$0xff] %v2347_v4 }
  0x79   : > { %389 = vst [vmem:[#allocation3 + $0x60] sm:$0xff] %v2347_v4  ;;  %390 = vst [vmem:[#allocation3 + $0x50] sm:$0xff] %v2347_v4 }
  0x7a PF: > { %415 = vxpose.xlu0.b32.start [1/4] (short) %v2602_v0, 128  ;;  %v394_v5 = vld [vmem:[%s2592_s27 + $0x18] sm:$0xff]  ;;  %v393_v6 = vld [vmem:[%s2592_s27 + $0x10] sm:$0xff]  ;;  %v392_v7 = vld [vmem:[%s2592_s27 + $0x8] sm:$0xff]  ;;  %vm447_vm0 = vcmask 261120  }
  0x7b   : > { %398 = vst [vmem:[%s2620_s29 + $0x18] sm:$0xff] %v394_v5  ;;  %1739 = vmatprep.subr.mxu0 %v394_v5  ;;  %397 = vst [vmem:[%s2620_s29 + $0x10] sm:$0xff] %v393_v6  ;;  %v391_v8 = vld [vmem:[%s2592_s27] sm:$0xff]  ;;  %1897 = vmatprep.subr.mxu1 %v394_v5  ;;  %v400_v25 = vld [vmem:[#allocation3 + $0x68] sm:$0xff] }
  0x7c   : > { %396 = vst [vmem:[%s2620_s29 + $0x8] sm:$0xff] %v392_v7  ;;  %1740 = vmatpush3.msra.mxu0 %v394_v5  ;;  %395 = vst [vmem:[%s2620_s29] sm:$0xff] %v391_v8  ;;  %1901 = vmatpush3.msra.mxu1 %v394_v5  ;;  %v399_v27 = vld [vmem:[#allocation3 + $0x28] sm:$0xff]  ;;  %v402_v31 = vld [vmem:[#allocation3 + $0x40] sm:$0xff] }
  0x7d   : > { %1741 = vmatprep.subr.mxu0 %v393_v6  ;;  %1898 = vmatprep.subr.mxu1 %v393_v6  ;;  %v401_v33 = vld [vmem:[#allocation3 + $0x10] sm:$0xff]  ;;  %v403_v39 = vld [vmem:[#allocation3 + $0x48] sm:$0xff]  ;;  %v406_v43 = vld [vmem:[#allocation3 + $0x38] sm:$0xff] }
  0x7e   : > { %416 = vxpose.xlu0.b32.cont [2/4] (short) %v2604_v1, 128  ;;  %1742 = vmatpush3.msra.mxu0 %v393_v6  ;;  %v404_v37 = vld [vmem:[#allocation3 + $0x30] sm:$0xff]  ;;  %v408_v49 = vld [vmem:[#allocation3 + $0x78] sm:$0xff]  ;;  %v407_v51 = vld [vmem:[#allocation3 + $0x20] sm:$0xff] }
  0x7f   : > { %1743 = vmatprep.subr.mxu0 %v392_v7  ;;  %1902 = vmatpush3.msra.mxu1 %v393_v6  ;;  %v405_v45 = vld [vmem:[#allocation3 + $0x70] sm:$0xff]  ;;  %v410_v55 = vld [vmem:[#allocation3 + $0x58] sm:$0xff]  ;;  %v412_v61 = vld [vmem:[#allocation3 + $0x8] sm:$0xff] }
  0x80   : > { %1744 = vmatpush3.msra.mxu0 %v392_v7  ;;  %1899 = vmatprep.subr.mxu1 %v392_v7  ;;  %v409_v57 = vld [vmem:[#allocation3 + $0x18] sm:$0xff]  ;;  %v411_v63 = vld [vmem:[#allocation3] sm:$0xff] }
  0x81   : > { %1745 = vmatprep.subr.mxu0 %v391_v8  ;;  %1903 = vmatpush3.msra.mxu1 %v392_v7  ;;  %v414_v7 = vld [vmem:[#allocation3 + $0x50] sm:$0xff] }
  0x82   : > { %417 = vxpose.xlu0.b32.cont [3/4] (short) %v2606_v2, 128  ;;  %1746 = vmatpush3.msra.mxu0 %v391_v8 }
  0x83   : > { %1900 = vmatprep.subr.mxu1 %v391_v8 }
  0x84   : > { %1904 = vmatpush3.msra.mxu1 %v391_v8 }
  0x86   : > { %418 = vxpose.xlu0.b32.end [4/4] (short) %v2608_v3, 128 }
  0xf6   : > { %v431_v9 = vpop.trf.xlu0 }
  0xf7   : > { %1747 = vmatprep.mubr.msk.f32.mxu0 %vm447_vm0, %v431_v9  ;;  %v413_v9 = vld [vmem:[#allocation3 + $0x60] sm:$0xff] }
  0xfa   : > { %v432_v10 = vpop.trf.xlu0 }
  0xfb   : > { %1748 = vmatmul.mubr.msk.f32.vlgmr.msra.gmra.mxu0 %vm447_vm0, %v432_v10 }
  0xfe   : > { %v433_v11 = vpop.trf.xlu0 }
  0xff   : > { %1750 = vmatprep.mubr.msk.f32.mxu0 %vm447_vm0, %v433_v11 }
 0x102   : > { %v434_v12 = vpop.trf.xlu0 }
 0x103   : > { %1751 = vmatmul.mubr.msk.f32.gmra.mxu0 %vm447_vm0, %v434_v12 }
 0x106   : > { %v435_v13 = vpop.trf.xlu0 }
 0x107   : > { %1753 = vmatprep.mubr.msk.f32.mxu0 %vm447_vm0, %v435_v13 }
 0x10a   : > { %v436_v14 = vpop.trf.xlu0 }
 0x10b   : > { %1754 = vmatmul.mubr.msk.f32.gmra.mxu0 %vm447_vm0, %v436_v14 }
 0x10e   : > { %v437_v15 = vpop.trf.xlu0 }
 0x10f   : > { %1756 = vmatprep.mubr.msk.f32.mxu0 %vm447_vm0, %v437_v15 }
 0x112   : > { %v438_v16 = vpop.trf.xlu0 }
 0x113   : > { %1757 = vmatmul.mubr.msk.f32.gmra.mxu0 %vm447_vm0, %v438_v16 }
 0x116   : > { %v439_v17 = vpop.trf.xlu0 }
 0x117   : > { %1759 = vmatprep.mubr.msk.f32.mxu1 %vm447_vm0, %v439_v17 }
 0x11a   : > { %v440_v18 = vpop.trf.xlu0 }
 0x11b   : > { %1760 = vmatmul.mubr.msk.f32.vlgmr.msra.gmra.mxu1 %vm447_vm0, %v440_v18 }
 0x11e   : > { %v441_v19 = vpop.trf.xlu0 }
 0x11f   : > { %1762 = vmatprep.mubr.msk.f32.mxu1 %vm447_vm0, %v441_v19 }
 0x122   : > { %v442_v20 = vpop.trf.xlu0 }
 0x123   : > { %1763 = vmatmul.mubr.msk.f32.gmra.mxu1 %vm447_vm0, %v442_v20 }
 0x126   : > { %v443_v21 = vpop.trf.xlu0 }
 0x127   : > { %1765 = vmatprep.mubr.msk.f32.mxu1 %vm447_vm0, %v443_v21 }
 0x12a   : > { %v444_v22 = vpop.trf.xlu0 }
 0x12b   : > { %1766 = vmatmul.mubr.msk.f32.gmra.mxu1 %vm447_vm0, %v444_v22 }
 0x12e   : > { %v445_v23 = vpop.trf.xlu0 }
 0x12f   : > { %1768 = vmatprep.mubr.msk.f32.mxu1 %vm447_vm0, %v445_v23 }
 0x132   : > { %v446_v24 = vpop.trf.xlu0 }
 0x133   : > { %1769 = vmatmul.mubr.msk.f32.gmra.mxu1 %vm447_vm0, %v446_v24 }
 0x1bb   : > { %v1749_v26 = vpop.f32.mrf.mxu0 }
 0x1bc   : > { %v642_v28 = vadd.f32 %v1749_v26, %v400_v25 }
 0x1bd   : > { %v562_v29 = vpop.f32.mrf.mxu0 }
 0x1be   : > { %658 = vst [vmem:[#allocation3 + $0x68] sm:$0xff] %v642_v28  ;;  %v641_v30 = vadd.f32 %v562_v29, %v399_v27 }
 0x1c0   : > { %657 = vst [vmem:[#allocation3 + $0x28] sm:$0xff] %v641_v30 }
 0x1c3   : > { %v1752_v32 = vpop.f32.mrf.mxu0 }
 0x1c4   : > { %v644_v34 = vadd.f32 %v1752_v32, %v402_v31 }
 0x1c5   : > { %v572_v35 = vpop.f32.mrf.mxu0 }
 0x1c6   : > { %660 = vst [vmem:[#allocation3 + $0x40] sm:$0xff] %v644_v34  ;;  %v643_v36 = vadd.f32 %v572_v35, %v401_v33 }
 0x1c8   : > { %659 = vst [vmem:[#allocation3 + $0x10] sm:$0xff] %v643_v36 }
 0x1cb   : > { %v1755_v38 = vpop.f32.mrf.mxu0 }
 0x1cc   : > { %v646_v40 = vadd.f32 %v1755_v38, %v404_v37 }
 0x1cd   : > { %v582_v41 = vpop.f32.mrf.mxu0 }
 0x1ce   : > { %662 = vst [vmem:[#allocation3 + $0x30] sm:$0xff] %v646_v40  ;;  %v645_v42 = vadd.f32 %v582_v41, %v403_v39 }
 0x1d0   : > { %661 = vst [vmem:[#allocation3 + $0x48] sm:$0xff] %v645_v42 }
 0x1d3   : > { %v1758_v44 = vpop.f32.mrf.mxu0 }
 0x1d4   : > { %v648_v46 = vadd.f32 %v1758_v44, %v406_v43 }
 0x1d5   : > { %v592_v47 = vpop.f32.mrf.mxu0 }
 0x1d6   : > { %664 = vst [vmem:[#allocation3 + $0x38] sm:$0xff] %v648_v46  ;;  %v647_v48 = vadd.f32 %v592_v47, %v405_v45 }
 0x1d8   : > { %663 = vst [vmem:[#allocation3 + $0x70] sm:$0xff] %v647_v48 }
 0x1db   : > { %v1761_v50 = vpop.f32.mrf.mxu1 }
 0x1dc   : > { %v650_v52 = vadd.f32 %v1761_v50, %v408_v49 }
 0x1dd   : > { %v602_v53 = vpop.f32.mrf.mxu1 }
 0x1de   : > { %666 = vst [vmem:[#allocation3 + $0x78] sm:$0xff] %v650_v52  ;;  %v649_v54 = vadd.f32 %v602_v53, %v407_v51 }
 0x1e0   : > { %665 = vst [vmem:[#allocation3 + $0x20] sm:$0xff] %v649_v54 }
 0x1e3   : > { %v1764_v56 = vpop.f32.mrf.mxu1 }
 0x1e4   : > { %v652_v58 = vadd.f32 %v1764_v56, %v410_v55 }
 0x1e5   : > { %v612_v59 = vpop.f32.mrf.mxu1 }
 0x1e6   : > { %668 = vst [vmem:[#allocation3 + $0x58] sm:$0xff] %v652_v58  ;;  %v651_v60 = vadd.f32 %v612_v59, %v409_v57 }
 0x1e8   : > { %667 = vst [vmem:[#allocation3 + $0x18] sm:$0xff] %v651_v60 }
 0x1eb   : > { %v1767_v62 = vpop.f32.mrf.mxu1 }
 0x1ec   : > { %v654_v4 = vadd.f32 %v1767_v62, %v412_v61 }
 0x1ed   : > { %v622_v5 = vpop.f32.mrf.mxu1 }
 0x1ee   : > { %670 = vst [vmem:[#allocation3 + $0x8] sm:$0xff] %v654_v4  ;;  %v653_v6 = vadd.f32 %v622_v5, %v411_v63 }
 0x1f0   : > { %669 = vst [vmem:[#allocation3] sm:$0xff] %v653_v6 }
 0x1f3   : > { %v1770_v8 = vpop.f32.mrf.mxu1 }
 0x1f4   : > { %v656_v10 = vadd.f32 %v1770_v8, %v414_v7 }
 0x1f5   : > { %v632_v11 = vpop.f32.mrf.mxu1 }
 0x1f6   : > { %672 = vst [vmem:[#allocation3 + $0x50] sm:$0xff] %v656_v10  ;;  %v655_v12 = vadd.f32 %v632_v11, %v413_v9 }
 0x1f8   : > { %671 = vst [vmem:[#allocation3 + $0x60] sm:$0xff] %v655_v12 }
 0x1f9 PF: > { %p1610_p12 = scmp.le.s32.totalorder %s2329_s25, 0 }
 0x1fa   : > { %s2915_s18 = sld [smem:[#allocation15_spill]] (!%p1610_p12) }
 0x1fb   : > { %676 = sbr.rel (%p1610_p12) target bundleno = 1520 (0x5f0), region = 56 }
 0x200   : > { %p1611_p5 = scmp.ne.s32.totalorder %s2915_s18, 0 }
 0x202   : > { %680 = sbr.rel (%p1611_p5) target bundleno = 871 (0x367), region = 60 }
 0x207   : > { %v682_v13 = vld [vmem:[%s2613_s12 + $0x8] sm:$0xff]  ;;  %v681_v14 = vld [vmem:[%s2613_s12] sm:$0xff]  ;;  %v2348_v15 = vmov 0   ;;  %v824_v18 = vld [vmem:[%s2618_s8 + $0x78] sm:$0xff]  ;;  %v2349_v27 = vmov 0.0  }
 0x208   : > { %2120 = vset.pattern.permute.xlu1 %v2348_v15  ;;  %2119 = vset.pattern.permute.xlu0 %v2348_v15  ;;  %v690_v16 = vld [vmem:[%s2613_s12 + $0x48] sm:$0xff]  ;;  %v689_v17 = vld [vmem:[%s2613_s12 + $0x40] sm:$0xff]  ;;  %v823_v19 = vld [vmem:[%s2618_s8 + $0x70] sm:$0xff] }
 0x209   : > { %720 = vperm.xlu1 %2120, %v682_v13   ;;  %715 = vperm.xlu0 %2119, %v681_v14   ;;  %v691_v20 = vld [vmem:[%s2613_s12 + $0x50] sm:$0xff]  ;;  %v692_v22 = vld [vmem:[%s2613_s12 + $0x58] sm:$0xff]  ;;  %v822_v23 = vld [vmem:[%s2618_s8 + $0x68] sm:$0xff] }
 0x20a   : > { %v683_v21 = vld [vmem:[%s2613_s12 + $0x10] sm:$0xff]  ;;  %1771 = vmatprep.subr.mxu0 %v824_v18  ;;  %1905 = vmatprep.subr.mxu1 %v824_v18  ;;  %v684_v24 = vld [vmem:[%s2613_s12 + $0x18] sm:$0xff]  ;;  %v821_v25 = vld [vmem:[%s2618_s8 + $0x60] sm:$0xff] }
 0x20b   : > { %1772 = vmatpush3.msra.mxu0 %v824_v18  ;;  %1921 = vmatpush3.msra.mxu1 %v824_v18  ;;  %v2666_v26 = vld [vmem:[#allocation3 + $0x68] sm:$0xff]  ;;  %v2671_v29 = vld [vmem:[#allocation3 + $0x78] sm:$0xff]  ;;  %v2673_v30 = vld [vmem:[#allocation3 + $0x20] sm:$0xff] }
 0x20c   : > { %1773 = vmatprep.subr.mxu0 %v823_v19  ;;  %1906 = vmatprep.subr.mxu1 %v823_v19  ;;  %987 = vst [vmem:[#allocation3 + $0x68] sm:$0xff] %v2349_v27  ;;  %v2669_v28 = vld [vmem:[#allocation3 + $0x28] sm:$0xff]  ;;  %995 = vst [vmem:[#allocation3 + $0x78] sm:$0xff] %v2349_v27  ;;  %v2678_v31 = vld [vmem:[#allocation3 + $0x18] sm:$0xff] }
 0x20d   : > { %760 = vperm.xlu1 %2120, %v690_v16   ;;  %755 = vperm.xlu0 %2119, %v689_v17   ;;  %986 = vst [vmem:[#allocation3 + $0x28] sm:$0xff] %v2349_v27  ;;  %994 = vst [vmem:[#allocation3 + $0x20] sm:$0xff] %v2349_v27  ;;  %v2680_v32 = vld [vmem:[#allocation3 + $0x10] sm:$0xff]  ;;  %v2682_v33 = vld [vmem:[#allocation3 + $0x58] sm:$0xff] }
 0x20e   : > { %1774 = vmatpush3.msra.mxu0 %v823_v19  ;;  %1922 = vmatpush3.msra.mxu1 %v823_v19  ;;  %996 = vst [vmem:[#allocation3 + $0x18] sm:$0xff] %v2349_v27  ;;  %988 = vst [vmem:[#allocation3 + $0x10] sm:$0xff] %v2349_v27  ;;  %v2687_v34 = vld [vmem:[#allocation3 + $0x40] sm:$0xff]  ;;  %v2691_v36 = vld [vmem:[#allocation3 + $0x48] sm:$0xff] }
 0x20f   : > { %1775 = vmatprep.subr.mxu0 %v822_v23  ;;  %1907 = vmatprep.subr.mxu1 %v822_v23  ;;  %997 = vst [vmem:[#allocation3 + $0x58] sm:$0xff] %v2349_v27  ;;  %v2689_v35 = vld [vmem:[#allocation3] sm:$0xff]  ;;  %v820_v37 = vld [vmem:[%s2618_s8 + $0x58] sm:$0xff]  ;;  %989 = vst [vmem:[#allocation3 + $0x40] sm:$0xff] %v2349_v27 }
 0x210   : > { %1776 = vmatpush3.msra.mxu0 %v822_v23  ;;  %1923 = vmatpush3.msra.mxu1 %v822_v23  ;;  %998 = vst [vmem:[#allocation3] sm:$0xff] %v2349_v27  ;;  %990 = vst [vmem:[#allocation3 + $0x48] sm:$0xff] %v2349_v27  ;;  %v693_v38 = vld [vmem:[%s2613_s12 + $0x60] sm:$0xff]  ;;  %v2699_v40 = vld [vmem:[#allocation3 + $0x8] sm:$0xff] }
 0x211   : > { %765 = vperm.xlu1 %2120, %v691_v20   ;;  %725 = vperm.xlu0 %2119, %v683_v21   ;;  %v685_v39 = vld [vmem:[%s2613_s12 + $0x20] sm:$0xff]  ;;  %v819_v41 = vld [vmem:[%s2618_s8 + $0x50] sm:$0xff]  ;;  %999 = vst [vmem:[#allocation3 + $0x8] sm:$0xff] %v2349_v27  ;;  %v694_v43 = vld [vmem:[%s2613_s12 + $0x68] sm:$0xff] }
 0x212   : > { %1777 = vmatprep.subr.mxu0 %v821_v25  ;;  %1908 = vmatprep.subr.mxu1 %v821_v25  ;;  %v2703_v42 = vld [vmem:[#allocation3 + $0x30] sm:$0xff]  ;;  %v686_v44 = vld [vmem:[%s2613_s12 + $0x28] sm:$0xff]  ;;  %v2709_v46 = vld [vmem:[#allocation3 + $0x60] sm:$0xff] }
 0x213   : > { %1778 = vmatpush3.msra.mxu0 %v821_v25  ;;  %1924 = vmatpush3.msra.mxu1 %v821_v25  ;;  %991 = vst [vmem:[#allocation3 + $0x30] sm:$0xff] %v2349_v27  ;;  %v818_v45 = vld [vmem:[%s2618_s8 + $0x48] sm:$0xff]  ;;  %1000 = vst [vmem:[#allocation3 + $0x60] sm:$0xff] %v2349_v27  ;;  %v2712_v47 = vld [vmem:[#allocation3 + $0x70] sm:$0xff] }
 0x214   : > { %1779 = vmatprep.subr.mxu0 %v820_v37  ;;  %1909 = vmatprep.subr.mxu1 %v820_v37  ;;  %v817_v48 = vld [vmem:[%s2618_s8 + $0x40] sm:$0xff]  ;;  %992 = vst [vmem:[#allocation3 + $0x70] sm:$0xff] %v2349_v27  ;;  %v695_v49 = vld [vmem:[%s2613_s12 + $0x70] sm:$0xff]  ;;  %v816_v52 = vld [vmem:[%s2618_s8 + $0x38] sm:$0xff] }
 0x215   : > { %770 = vperm.xlu1 %2120, %v692_v22   ;;  %730 = vperm.xlu0 %2119, %v684_v24   ;;  %v687_v50 = vld [vmem:[%s2613_s12 + $0x30] sm:$0xff]  ;;  %v2722_v53 = vld [vmem:[#allocation3 + $0x38] sm:$0xff]  ;;  %v814_v57 = vld [vmem:[%s2618_s8 + $0x28] sm:$0xff] }
 0x216   : > { %1780 = vmatpush3.msra.mxu0 %v820_v37  ;;  %1925 = vmatpush3.msra.mxu1 %v820_v37  ;;  %v2718_v51 = vld [vmem:[#allocation3 + $0x50] sm:$0xff]  ;;  %993 = vst [vmem:[#allocation3 + $0x38] sm:$0xff] %v2349_v27  ;;  %v696_v54 = vld [vmem:[%s2613_s12 + $0x78] sm:$0xff]  ;;  %v813_v58 = vld [vmem:[%s2618_s8 + $0x20] sm:$0xff] }
 0x217   : > { %1781 = vmatprep.subr.mxu0 %v819_v41  ;;  %1910 = vmatprep.subr.mxu1 %v819_v41  ;;  %1001 = vst [vmem:[#allocation3 + $0x50] sm:$0xff] %v2349_v27  ;;  %v688_v55 = vld [vmem:[%s2613_s12 + $0x38] sm:$0xff]  ;;  %v815_v56 = vld [vmem:[%s2618_s8 + $0x30] sm:$0xff]  ;;  %v810_v61 = vld [vmem:[%s2618_s8 + $0x8] sm:$0xff] }
 0x218   : > { %1782 = vmatpush3.msra.mxu0 %v819_v41  ;;  %1926 = vmatpush3.msra.mxu1 %v819_v41  ;;  %v812_v59 = vld [vmem:[%s2618_s8 + $0x18] sm:$0xff]  ;;  %v811_v60 = vld [vmem:[%s2618_s8 + $0x10] sm:$0xff]  ;;  %v809_v62 = vld [vmem:[%s2618_s8] sm:$0xff] }
 0x219   : > { %775 = vperm.xlu1 %2120, %v693_v38   ;;  %735 = vperm.xlu0 %2119, %v685_v39  }
 0x21a   : > { %1783 = vmatprep.subr.mxu0 %v818_v45  ;;  %1911 = vmatprep.subr.mxu1 %v818_v45 }
 0x21b   : > { %1784 = vmatpush3.msra.mxu0 %v818_v45  ;;  %1927 = vmatpush3.msra.mxu1 %v818_v45 }
 0x21c   : > { %1785 = vmatprep.subr.mxu0 %v817_v48  ;;  %1912 = vmatprep.subr.mxu1 %v817_v48 }
 0x21d   : > { %780 = vperm.xlu1 %2120, %v694_v43   ;;  %740 = vperm.xlu0 %2119, %v686_v44  }
 0x21e   : > { %1786 = vmatpush3.msra.mxu0 %v817_v48  ;;  %1928 = vmatpush3.msra.mxu1 %v817_v48 }
 0x21f   : > { %1787 = vmatprep.subr.mxu0 %v816_v52  ;;  %1913 = vmatprep.subr.mxu1 %v816_v52 }
 0x220   : > { %1788 = vmatpush3.msra.mxu0 %v816_v52  ;;  %1929 = vmatpush3.msra.mxu1 %v816_v52 }
 0x221   : > { %785 = vperm.xlu1 %2120, %v695_v49   ;;  %745 = vperm.xlu0 %2119, %v687_v50  }
 0x222   : > { %1789 = vmatprep.subr.mxu0 %v815_v56  ;;  %1914 = vmatprep.subr.mxu1 %v815_v56 }
 0x223   : > { %1790 = vmatpush3.msra.mxu0 %v815_v56  ;;  %1930 = vmatpush3.msra.mxu1 %v815_v56 }
 0x224   : > { %1791 = vmatprep.subr.mxu0 %v814_v57  ;;  %1915 = vmatprep.subr.mxu1 %v814_v57 }
 0x225   : > { %790 = vperm.xlu1 %2120, %v696_v54   ;;  %750 = vperm.xlu0 %2119, %v688_v55  }
 0x226   : > { %1792 = vmatpush3.msra.mxu0 %v814_v57  ;;  %1931 = vmatpush3.msra.mxu1 %v814_v57 }
 0x227   : > { %1793 = vmatprep.subr.mxu0 %v813_v58  ;;  %1916 = vmatprep.subr.mxu1 %v813_v58 }
 0x228   : > { %1794 = vmatpush3.msra.mxu0 %v813_v58  ;;  %1932 = vmatpush3.msra.mxu1 %v813_v58 }
 0x229   : > { %1795 = vmatprep.subr.mxu0 %v812_v59  ;;  %1917 = vmatprep.subr.mxu1 %v812_v59 }
 0x22a   : > { %1796 = vmatpush3.msra.mxu0 %v812_v59  ;;  %1933 = vmatpush3.msra.mxu1 %v812_v59 }
 0x22b   : > { %1797 = vmatprep.subr.mxu0 %v811_v60  ;;  %1918 = vmatprep.subr.mxu1 %v811_v60 }
 0x22c   : > { %1798 = vmatpush3.msra.mxu0 %v811_v60  ;;  %1934 = vmatpush3.msra.mxu1 %v811_v60 }
 0x22d   : > { %1799 = vmatprep.subr.mxu0 %v810_v61  ;;  %1919 = vmatprep.subr.mxu1 %v810_v61 }
 0x22e   : > { %1800 = vmatpush3.msra.mxu0 %v810_v61  ;;  %1935 = vmatpush3.msra.mxu1 %v810_v61 }
 0x22f   : > { %1801 = vmatprep.subr.mxu0 %v809_v62  ;;  %1920 = vmatprep.subr.mxu1 %v809_v62 }
 0x230   : > { %1802 = vmatpush3.msra.mxu0 %v809_v62  ;;  %1936 = vmatpush3.msra.mxu1 %v809_v62 }
 0x284   : > { %v721_v63 = vpop.permute.xlu1 %720  ;;  %v716_v4 = vpop.permute.xlu0 %715 }
 0x285   : > { %v794_v5 = vmul.f32 %v721_v63, %v2666_v26  ;;  %v793_v6 = vmul.f32 %v716_v4, %v2669_v28 }
 0x287   : > { %1803 = vmatprep.mubr.f32.mxu0 %v793_v6 }
 0x288   : > { %v761_v7 = vpop.permute.xlu1 %760  ;;  %1804 = vmatmul.mubr.f32.vlgmr.msra.gmra.mxu0 %v794_v5  ;;  %v756_v8 = vpop.permute.xlu0 %755 }
 0x289   : > { %v802_v9 = vmul.f32 %v761_v7, %v2671_v29  ;;  %v801_v10 = vmul.f32 %v756_v8, %v2673_v30 }
 0x28b   : > { %1815 = vmatprep.mubr.f32.mxu1 %v801_v10 }
 0x28c   : > { %v766_v11 = vpop.permute.xlu1 %765  ;;  %1816 = vmatmul.mubr.f32.vlgmr.msra.gmra.mxu1 %v802_v9  ;;  %v726_v12 = vpop.permute.xlu0 %725 }
 0x28d   : > { %v803_v13 = vmul.f32 %v766_v11, %v2678_v31  ;;  %v795_v14 = vmul.f32 %v726_v12, %v2680_v32 }
 0x28f   : > { %1806 = vmatprep.mubr.f32.mxu0 %v795_v14  ;;  %1818 = vmatprep.mubr.f32.mxu1 %v803_v13 }
 0x290   : > { %v771_v15 = vpop.permute.xlu1 %770  ;;  %v731_v16 = vpop.permute.xlu0 %730 }
 0x291   : > { %v804_v17 = vmul.f32 %v771_v15, %v2682_v33  ;;  %v796_v18 = vmul.f32 %v731_v16, %v2687_v34 }
 0x293   : > { %1807 = vmatmul.mubr.f32.gmra.mxu0 %v796_v18  ;;  %1819 = vmatmul.mubr.f32.gmra.mxu1 %v804_v17 }
 0x294   : > { %v776_v19 = vpop.permute.xlu1 %775  ;;  %v736_v20 = vpop.permute.xlu0 %735 }
 0x295   : > { %v805_v21 = vmul.f32 %v776_v19, %v2689_v35  ;;  %v797_v22 = vmul.f32 %v736_v20, %v2691_v36 }
 0x297   : > { %1809 = vmatprep.mubr.f32.mxu0 %v797_v22  ;;  %1821 = vmatprep.mubr.f32.mxu1 %v805_v21 }
 0x298   : > { %v781_v23 = vpop.permute.xlu1 %780  ;;  %v741_v24 = vpop.permute.xlu0 %740 }
 0x299   : > { %v806_v25 = vmul.f32 %v781_v23, %v2699_v40  ;;  %v798_v26 = vmul.f32 %v741_v24, %v2703_v42 }
 0x29b   : > { %1810 = vmatmul.mubr.f32.gmra.mxu0 %v798_v26  ;;  %1822 = vmatmul.mubr.f32.gmra.mxu1 %v806_v25 }
 0x29c   : > { %v786_v27 = vpop.permute.xlu1 %785  ;;  %v746_v28 = vpop.permute.xlu0 %745 }
 0x29d   : > { %v807_v29 = vmul.f32 %v786_v27, %v2709_v46  ;;  %v799_v30 = vmul.f32 %v746_v28, %v2712_v47 }
 0x29f   : > { %1812 = vmatprep.mubr.f32.mxu0 %v799_v30  ;;  %1824 = vmatprep.mubr.f32.mxu1 %v807_v29 }
 0x2a0   : > { %v791_v31 = vpop.permute.xlu1 %790  ;;  %v751_v32 = vpop.permute.xlu0 %750 }
 0x2a1   : > { %v808_v33 = vmul.f32 %v791_v31, %v2718_v51  ;;  %v800_v34 = vmul.f32 %v751_v32, %v2722_v53 }
 0x2a3   : > { %1813 = vmatmul.mubr.f32.gmra.mxu0 %v800_v34  ;;  %1825 = vmatmul.mubr.f32.gmra.mxu1 %v808_v33 }
 0x348   : > { %v1805_v35 = vpop.f32.mrf.mxu0 }
 0x349   : > { %971 = vst [vmem:[#allocation2] sm:$0xff] %v1805_v35 }
 0x34a   : > { %v891_v36 = vpop.f32.mrf.mxu0 }
 0x34b   : > { %970 = vst [vmem:[#allocation2 + $0x30] sm:$0xff] %v891_v36 }
 0x34c   : > { %v1817_v37 = vpop.f32.mrf.mxu1 }
 0x34d   : > { %979 = vst [vmem:[#allocation2 + $0x20] sm:$0xff] %v1817_v37 }
 0x34e   : > { %v931_v38 = vpop.f32.mrf.mxu1 }
 0x34f   : > { %978 = vst [vmem:[#allocation2 + $0x40] sm:$0xff] %v931_v38 }
 0x353   : > { %v1808_v39 = vpop.f32.mrf.mxu0  ;;  %v1820_v40 = vpop.f32.mrf.mxu1 }
 0x354   : > { %973 = vst [vmem:[#allocation2 + $0x18] sm:$0xff] %v1808_v39  ;;  %981 = vst [vmem:[#allocation2 + $0x38] sm:$0xff] %v1820_v40 }
 0x355   : > { %v901_v41 = vpop.f32.mrf.mxu0  ;;  %v941_v42 = vpop.f32.mrf.mxu1 }
 0x356   : > { %972 = vst [vmem:[#allocation2 + $0x58] sm:$0xff] %v901_v41  ;;  %980 = vst [vmem:[#allocation2 + $0x10] sm:$0xff] %v941_v42 }
 0x35b   : > { %v1811_v43 = vpop.f32.mrf.mxu0  ;;  %v1823_v44 = vpop.f32.mrf.mxu1 }
 0x35c   : > { %975 = vst [vmem:[#allocation2 + $0x68] sm:$0xff] %v1811_v43  ;;  %983 = vst [vmem:[#allocation2 + $0x70] sm:$0xff] %v1823_v44 }
 0x35d   : > { %v911_v45 = vpop.f32.mrf.mxu0  ;;  %v951_v46 = vpop.f32.mrf.mxu1 }
 0x35e   : > { %974 = vst [vmem:[#allocation2 + $0x50] sm:$0xff] %v911_v45  ;;  %982 = vst [vmem:[#allocation2 + $0x60] sm:$0xff] %v951_v46 }
 0x363   : > { %v1814_v47 = vpop.f32.mrf.mxu0  ;;  %v1826_v48 = vpop.f32.mrf.mxu1 }
 0x364   : > { %977 = vst [vmem:[#allocation2 + $0x48] sm:$0xff] %v1814_v47  ;;  %985 = vst [vmem:[#allocation2 + $0x28] sm:$0xff] %v1826_v48 }
 0x365   : > { %v921_v49 = vpop.f32.mrf.mxu0  ;;  %v961_v50 = vpop.f32.mrf.mxu1 }
 0x366   : > { %976 = vst [vmem:[#allocation2 + $0x8] sm:$0xff] %v921_v49  ;;  %984 = vst [vmem:[#allocation2 + $0x78] sm:$0xff] %v961_v50 }
 0x367 PF: > { %1859 = vmatprep.mubr.f32.mxu0 %v2602_v0  ;;  %1862 = vmatprep.mubr.f32.mxu1 %v2606_v2  ;;  %v1015_v53 = vld [vmem:[#allocation2 + $0x70] sm:$0xff]  ;;  %v1014_v54 = vld [vmem:[#allocation2 + $0x60] sm:$0xff]  ;;  %v1013_v55 = vld [vmem:[#allocation2 + $0x38] sm:$0xff]  ;;  %p1616_p1 = scmp.ge.s32.totalorder %s2329_s25, 2 }
 0x368   : > { %v1012_v56 = vld [vmem:[#allocation2 + $0x10] sm:$0xff]  ;;  %v1011_v57 = vld [vmem:[#allocation2 + $0x20] sm:$0xff]  ;;  %v1007_v61 = vld [vmem:[#allocation2 + $0x68] sm:$0xff] }
 0x369   : > { %v1010_v58 = vld [vmem:[#allocation2 + $0x40] sm:$0xff]  ;;  %v1006_v62 = vld [vmem:[#allocation2 + $0x50] sm:$0xff]  ;;  %v1005_v63 = vld [vmem:[#allocation2 + $0x18] sm:$0xff] }
 0x36a   : > { %v1004_v4 = vld [vmem:[#allocation2 + $0x58] sm:$0xff]  ;;  %v1003_v5 = vld [vmem:[#allocation2] sm:$0xff]  ;;  %v1002_v6 = vld [vmem:[#allocation2 + $0x30] sm:$0xff] }
 0x36b   : > { %v1017_v51 = vld [vmem:[#allocation2 + $0x28] sm:$0xff] }
 0x36c   : > { %1827 = vmatprep.subr.mxu0 %v1017_v51  ;;  %1937 = vmatprep.subr.mxu1 %v1017_v51  ;;  %v1009_v59 = vld [vmem:[#allocation2 + $0x48] sm:$0xff] }
 0x36d   : > { %v1016_v52 = vld [vmem:[#allocation2 + $0x78] sm:$0xff]  ;;  %1828 = vmatpush3.msra.mxu0 %v1017_v51  ;;  %1953 = vmatpush3.msra.mxu1 %v1017_v51  ;;  %v1008_v60 = vld [vmem:[#allocation2 + $0x8] sm:$0xff] }
 0x36e   : > { %1829 = vmatprep.subr.mxu0 %v1016_v52  ;;  %1938 = vmatprep.subr.mxu1 %v1016_v52 }
 0x36f   : > { %1830 = vmatpush3.msra.mxu0 %v1016_v52  ;;  %1954 = vmatpush3.msra.mxu1 %v1016_v52 }
 0x370   : > { %1831 = vmatprep.subr.mxu0 %v1015_v53  ;;  %1939 = vmatprep.subr.mxu1 %v1015_v53 }
 0x371   : > { %1832 = vmatpush3.msra.mxu0 %v1015_v53  ;;  %1955 = vmatpush3.msra.mxu1 %v1015_v53 }
 0x372   : > { %1833 = vmatprep.subr.mxu0 %v1014_v54  ;;  %1940 = vmatprep.subr.mxu1 %v1014_v54 }
 0x373   : > { %1834 = vmatpush3.msra.mxu0 %v1014_v54  ;;  %1956 = vmatpush3.msra.mxu1 %v1014_v54 }
 0x374   : > { %1835 = vmatprep.subr.mxu0 %v1013_v55  ;;  %1941 = vmatprep.subr.mxu1 %v1013_v55 }
 0x375   : > { %1836 = vmatpush3.msra.mxu0 %v1013_v55  ;;  %1957 = vmatpush3.msra.mxu1 %v1013_v55 }
 0x376   : > { %1837 = vmatprep.subr.mxu0 %v1012_v56  ;;  %1942 = vmatprep.subr.mxu1 %v1012_v56 }
 0x377   : > { %1838 = vmatpush3.msra.mxu0 %v1012_v56  ;;  %1958 = vmatpush3.msra.mxu1 %v1012_v56 }
 0x378   : > { %1839 = vmatprep.subr.mxu0 %v1011_v57  ;;  %1943 = vmatprep.subr.mxu1 %v1011_v57 }
 0x379   : > { %1840 = vmatpush3.msra.mxu0 %v1011_v57  ;;  %1959 = vmatpush3.msra.mxu1 %v1011_v57 }
 0x37a   : > { %1841 = vmatprep.subr.mxu0 %v1010_v58  ;;  %1944 = vmatprep.subr.mxu1 %v1010_v58 }
 0x37b   : > { %1842 = vmatpush3.msra.mxu0 %v1010_v58  ;;  %1960 = vmatpush3.msra.mxu1 %v1010_v58 }
 0x37c   : > { %1843 = vmatprep.subr.mxu0 %v1009_v59  ;;  %1945 = vmatprep.subr.mxu1 %v1009_v59 }
 0x37d   : > { %1844 = vmatpush3.msra.mxu0 %v1009_v59  ;;  %1961 = vmatpush3.msra.mxu1 %v1009_v59 }
 0x37e   : > { %1845 = vmatprep.subr.mxu0 %v1008_v60  ;;  %1946 = vmatprep.subr.mxu1 %v1008_v60 }
 0x37f   : > { %1846 = vmatpush3.msra.mxu0 %v1008_v60  ;;  %1962 = vmatpush3.msra.mxu1 %v1008_v60 }
 0x380   : > { %1847 = vmatprep.subr.mxu0 %v1007_v61  ;;  %1947 = vmatprep.subr.mxu1 %v1007_v61 }
 0x381   : > { %1848 = vmatpush3.msra.mxu0 %v1007_v61  ;;  %1963 = vmatpush3.msra.mxu1 %v1007_v61 }
 0x382   : > { %1849 = vmatprep.subr.mxu0 %v1006_v62  ;;  %1948 = vmatprep.subr.mxu1 %v1006_v62 }
 0x383   : > { %1850 = vmatpush3.msra.mxu0 %v1006_v62  ;;  %1964 = vmatpush3.msra.mxu1 %v1006_v62 }
 0x384   : > { %1851 = vmatprep.subr.mxu0 %v1005_v63  ;;  %1949 = vmatprep.subr.mxu1 %v1005_v63 }
 0x385   : > { %1852 = vmatpush3.msra.mxu0 %v1005_v63  ;;  %1965 = vmatpush3.msra.mxu1 %v1005_v63 }
 0x386   : > { %1853 = vmatprep.subr.mxu0 %v1004_v4  ;;  %1950 = vmatprep.subr.mxu1 %v1004_v4 }
 0x387   : > { %1854 = vmatpush3.msra.mxu0 %v1004_v4  ;;  %1966 = vmatpush3.msra.mxu1 %v1004_v4 }
 0x388   : > { %1855 = vmatprep.subr.mxu0 %v1003_v5  ;;  %1951 = vmatprep.subr.mxu1 %v1003_v5 }
 0x389   : > { %1856 = vmatpush3.msra.mxu0 %v1003_v5  ;;  %1967 = vmatpush3.msra.mxu1 %v1003_v5 }
 0x38a   : > { %1857 = vmatprep.subr.mxu0 %v1002_v6  ;;  %1952 = vmatprep.subr.mxu1 %v1002_v6 }
 0x38b   : > { %1858 = vmatpush3.msra.mxu0 %v1002_v6  ;;  %1968 = vmatpush3.msra.mxu1 %v1002_v6 }
 0x38c   : > { %1860 = vmatmul.mubr.f32.vlgmr.msra.gmra.mxu0 %v2604_v1  ;;  %1863 = vmatmul.mubr.f32.vlgmr.msra.gmra.mxu1 %v2608_v3 }
 0x44c   : > { %v1861_v7 = vpop.f32.mrf.mxu0  ;;  %v1864_v8 = vpop.f32.mrf.mxu1 }
 0x44d   : > { %v1613_v9 = vmul.f32 -1.442695, %v1861_v7  ;;  %v1615_v10 = vmul.f32 -1.442695, %v1864_v8 }
 0x44e   : > { %v1084_v11 = vpop.f32.mrf.mxu0  ;;  %v1094_v12 = vpop.f32.mrf.mxu1 }
 0x44f   : > { %2121 = vpow2.f32 %v1613_v9  ;;  %v1612_v13 = vmul.f32 -1.442695, %v1084_v11  ;;  %v1614_v14 = vmul.f32 -1.442695, %v1094_v12 }
 0x450   : > { %2123 = vpow2.f32 %v1615_v10 }
 0x451   : > { %2125 = vpow2.f32 %v1612_v13 }
 0x452   : > { %2127 = vpow2.f32 %v1614_v14 }
 0x45c   : > { %v2122_v15 = vpop.eup %2121 }
 0x45d   : > { %v2124_v16 = vpop.eup %2123  ;;  %v1116_v17 = vadd.f32 1.0, %v2122_v15 }
 0x45e   : > { %v2126_v18 = vpop.eup %2125  ;;  %v1118_v19 = vadd.f32 1.0, %v2124_v16 }
 0x45f   : > { %v2128_v20 = vpop.eup %2127  ;;  %2129 = vrcp.f32 %v1116_v17  ;;  %v1115_v21 = vadd.f32 1.0, %v2126_v18 }
 0x460   : > { %2131 = vrcp.f32 %v1118_v19  ;;  %v1117_v22 = vadd.f32 1.0, %v2128_v20 }
 0x461   : > { %2133 = vrcp.f32 %v1115_v21 }
 0x462   : > { %2135 = vrcp.f32 %v1117_v22 }
 0x46c   : > { %v2130_v23 = vpop.eup %2129  ;;  %1134 = sbr.rel (%p1616_p1) target bundleno = 1520 (0x5f0), region = 64 }
 0x46d   : > { %v2132_v24 = vpop.eup %2131  ;;  %1128 = vst [vmem:[%s2620_s29 + $0x8] sm:$0xff] %v2130_v23 }
 0x46e   : > { %v2134_v25 = vpop.eup %2133  ;;  %1130 = vst [vmem:[%s2620_s29 + $0x18] sm:$0xff] %v2132_v24 }
 0x46f   : > { %v2136_v26 = vpop.eup %2135  ;;  %1127 = vst [vmem:[%s2620_s29] sm:$0xff] %v2134_v25 }
 0x470   : > { %1129 = vst [vmem:[%s2620_s29 + $0x10] sm:$0xff] %v2136_v26 }
 0x471   : > { %1151 = vxpose.xlu0.b32.start [1/4] (short) %v2602_v0, 128  ;;  %1865 = vmatprep.subr.mxu0 %v2132_v24  ;;  %vm1183_vm1 = vcmask 261120   ;;  %v1136_v39 = vld [vmem:[#allocation3 + $0x68] sm:$0xff]  ;;  %v1138_v45 = vld [vmem:[#allocation3 + $0x40] sm:$0xff]  ;;  %v1137_v47 = vld [vmem:[#allocation3 + $0x10] sm:$0xff] }
 0x472   : > { %1866 = vmatpush3.msra.mxu0 %v2132_v24  ;;  %1969 = vmatprep.subr.mxu1 %v2132_v24  ;;  %v1135_v41 = vld [vmem:[#allocation3 + $0x28] sm:$0xff]  ;;  %v1140_v51 = vld [vmem:[#allocation3 + $0x30] sm:$0xff]  ;;  %v1142_v57 = vld [vmem:[#allocation3 + $0x38] sm:$0xff] }
 0x473   : > { %1867 = vmatprep.subr.mxu0 %v2136_v26  ;;  %1973 = vmatpush3.msra.mxu1 %v2132_v24  ;;  %v1139_v53 = vld [vmem:[#allocation3 + $0x48] sm:$0xff]  ;;  %v1141_v59 = vld [vmem:[#allocation3 + $0x70] sm:$0xff]  ;;  %v1144_v63 = vld [vmem:[#allocation3 + $0x78] sm:$0xff] }
 0x474   : > { %1868 = vmatpush3.msra.mxu0 %v2136_v26  ;;  %1970 = vmatprep.subr.mxu1 %v2136_v26  ;;  %v1143_v5 = vld [vmem:[#allocation3 + $0x20] sm:$0xff]  ;;  %v1146_v9 = vld [vmem:[#allocation3 + $0x58] sm:$0xff]  ;;  %v1148_v15 = vld [vmem:[#allocation3 + $0x8] sm:$0xff] }
 0x475   : > { %1152 = vxpose.xlu0.b32.cont [2/4] (short) %v2604_v1, 128  ;;  %1869 = vmatprep.subr.mxu0 %v2130_v23  ;;  %v1145_v11 = vld [vmem:[#allocation3 + $0x18] sm:$0xff]  ;;  %v1147_v17 = vld [vmem:[#allocation3] sm:$0xff]  ;;  %v1150_v21 = vld [vmem:[#allocation3 + $0x50] sm:$0xff] }
 0x476   : > { %1870 = vmatpush3.msra.mxu0 %v2130_v23  ;;  %1974 = vmatpush3.msra.mxu1 %v2136_v26 }
 0x477   : > { %1871 = vmatprep.subr.mxu0 %v2134_v25  ;;  %1971 = vmatprep.subr.mxu1 %v2130_v23 }
 0x478   : > { %1872 = vmatpush3.msra.mxu0 %v2134_v25  ;;  %1975 = vmatpush3.msra.mxu1 %v2130_v23  ;;  %v1149_v23 = vld [vmem:[#allocation3 + $0x60] sm:$0xff] }
 0x479   : > { %1153 = vxpose.xlu0.b32.cont [3/4] (short) %v2606_v2, 128  ;;  %1972 = vmatprep.subr.mxu1 %v2134_v25 }
 0x47a   : > { %1976 = vmatpush3.msra.mxu1 %v2134_v25 }
 0x47d   : > { %1154 = vxpose.xlu0.b32.end [4/4] (short) %v2608_v3, 128 }
 0x4ed   : > { %v1167_v0 = vpop.trf.xlu0 }
 0x4ee   : > { %1873 = vmatprep.mubr.msk.f32.mxu0 %vm1183_vm1, %v1167_v0 }
 0x4f1   : > { %v1168_v27 = vpop.trf.xlu0 }
 0x4f2   : > { %1874 = vmatmul.mubr.msk.f32.vlgmr.msra.gmra.mxu0 %vm1183_vm1, %v1168_v27 }
 0x4f5   : > { %v1169_v1 = vpop.trf.xlu0 }
 0x4f6   : > { %1876 = vmatprep.mubr.msk.f32.mxu0 %vm1183_vm1, %v1169_v1 }
 0x4f9   : > { %v1170_v28 = vpop.trf.xlu0 }
 0x4fa   : > { %1877 = vmatmul.mubr.msk.f32.gmra.mxu0 %vm1183_vm1, %v1170_v28 }
 0x4fd   : > { %v1171_v29 = vpop.trf.xlu0 }
 0x4fe   : > { %1879 = vmatprep.mubr.msk.f32.mxu0 %vm1183_vm1, %v1171_v29 }
 0x501   : > { %v1172_v2 = vpop.trf.xlu0 }
 0x502   : > { %1880 = vmatmul.mubr.msk.f32.gmra.mxu0 %vm1183_vm1, %v1172_v2 }
 0x505   : > { %v1173_v3 = vpop.trf.xlu0 }
 0x506   : > { %1882 = vmatprep.mubr.msk.f32.mxu0 %vm1183_vm1, %v1173_v3 }
 0x509   : > { %v1174_v30 = vpop.trf.xlu0 }
 0x50a   : > { %1883 = vmatmul.mubr.msk.f32.gmra.mxu0 %vm1183_vm1, %v1174_v30 }
 0x50d   : > { %v1175_v31 = vpop.trf.xlu0 }
 0x50e   : > { %1885 = vmatprep.mubr.msk.f32.mxu1 %vm1183_vm1, %v1175_v31 }
 0x511   : > { %v1176_v32 = vpop.trf.xlu0 }
 0x512   : > { %1886 = vmatmul.mubr.msk.f32.vlgmr.msra.gmra.mxu1 %vm1183_vm1, %v1176_v32 }
 0x515   : > { %v1177_v33 = vpop.trf.xlu0 }
 0x516   : > { %1888 = vmatprep.mubr.msk.f32.mxu1 %vm1183_vm1, %v1177_v33 }
 0x519   : > { %v1178_v34 = vpop.trf.xlu0 }
 0x51a   : > { %1889 = vmatmul.mubr.msk.f32.gmra.mxu1 %vm1183_vm1, %v1178_v34 }
 0x51d   : > { %v1179_v35 = vpop.trf.xlu0 }
 0x51e   : > { %1891 = vmatprep.mubr.msk.f32.mxu1 %vm1183_vm1, %v1179_v35 }
 0x521   : > { %v1180_v36 = vpop.trf.xlu0 }
 0x522   : > { %1892 = vmatmul.mubr.msk.f32.gmra.mxu1 %vm1183_vm1, %v1180_v36 }
 0x525   : > { %v1181_v37 = vpop.trf.xlu0 }
 0x526   : > { %1894 = vmatprep.mubr.msk.f32.mxu1 %vm1183_vm1, %v1181_v37 }
 0x529   : > { %v1182_v38 = vpop.trf.xlu0 }
 0x52a   : > { %1895 = vmatmul.mubr.msk.f32.gmra.mxu1 %vm1183_vm1, %v1182_v38 }
 0x5b2   : > { %v1875_v40 = vpop.f32.mrf.mxu0 }
 0x5b3   : > { %v1378_v42 = vadd.f32 %v1875_v40, %v1136_v39 }
 0x5b4   : > { %v1298_v43 = vpop.f32.mrf.mxu0 }
 0x5b5   : > { %1394 = vst [vmem:[#allocation3 + $0x68] sm:$0xff] %v1378_v42  ;;  %v1377_v44 = vadd.f32 %v1298_v43, %v1135_v41 }
 0x5b7   : > { %1393 = vst [vmem:[#allocation3 + $0x28] sm:$0xff] %v1377_v44 }
 0x5ba   : > { %v1878_v46 = vpop.f32.mrf.mxu0 }
 0x5bb   : > { %v1380_v48 = vadd.f32 %v1878_v46, %v1138_v45 }
 0x5bc   : > { %v1308_v49 = vpop.f32.mrf.mxu0 }
 0x5bd   : > { %1396 = vst [vmem:[#allocation3 + $0x40] sm:$0xff] %v1380_v48  ;;  %v1379_v50 = vadd.f32 %v1308_v49, %v1137_v47 }
 0x5bf   : > { %1395 = vst [vmem:[#allocation3 + $0x10] sm:$0xff] %v1379_v50 }
 0x5c2   : > { %v1881_v52 = vpop.f32.mrf.mxu0 }
 0x5c3   : > { %v1382_v54 = vadd.f32 %v1881_v52, %v1140_v51 }
 0x5c4   : > { %v1318_v55 = vpop.f32.mrf.mxu0 }
 0x5c5   : > { %1398 = vst [vmem:[#allocation3 + $0x30] sm:$0xff] %v1382_v54  ;;  %v1381_v56 = vadd.f32 %v1318_v55, %v1139_v53 }
 0x5c7   : > { %1397 = vst [vmem:[#allocation3 + $0x48] sm:$0xff] %v1381_v56 }
 0x5ca   : > { %v1884_v58 = vpop.f32.mrf.mxu0 }
 0x5cb   : > { %v1384_v60 = vadd.f32 %v1884_v58, %v1142_v57 }
 0x5cc   : > { %v1328_v61 = vpop.f32.mrf.mxu0 }
 0x5cd   : > { %1400 = vst [vmem:[#allocation3 + $0x38] sm:$0xff] %v1384_v60  ;;  %v1383_v62 = vadd.f32 %v1328_v61, %v1141_v59 }
 0x5cf   : > { %1399 = vst [vmem:[#allocation3 + $0x70] sm:$0xff] %v1383_v62 }
 0x5d2   : > { %v1887_v4 = vpop.f32.mrf.mxu1 }
 0x5d3   : > { %v1386_v6 = vadd.f32 %v1887_v4, %v1144_v63 }
 0x5d4   : > { %v1338_v7 = vpop.f32.mrf.mxu1 }
 0x5d5   : > { %1402 = vst [vmem:[#allocation3 + $0x78] sm:$0xff] %v1386_v6  ;;  %v1385_v8 = vadd.f32 %v1338_v7, %v1143_v5 }
 0x5d7   : > { %1401 = vst [vmem:[#allocation3 + $0x20] sm:$0xff] %v1385_v8 }
 0x5da   : > { %v1890_v10 = vpop.f32.mrf.mxu1 }
 0x5db   : > { %v1388_v12 = vadd.f32 %v1890_v10, %v1146_v9 }
 0x5dc   : > { %v1348_v13 = vpop.f32.mrf.mxu1 }
 0x5dd   : > { %1404 = vst [vmem:[#allocation3 + $0x58] sm:$0xff] %v1388_v12  ;;  %v1387_v14 = vadd.f32 %v1348_v13, %v1145_v11 }
 0x5df   : > { %1403 = vst [vmem:[#allocation3 + $0x18] sm:$0xff] %v1387_v14 }
 0x5e2   : > { %v1893_v16 = vpop.f32.mrf.mxu1 }
 0x5e3   : > { %v1390_v18 = vadd.f32 %v1893_v16, %v1148_v15 }
 0x5e4   : > { %v1358_v19 = vpop.f32.mrf.mxu1 }
 0x5e5   : > { %1406 = vst [vmem:[#allocation3 + $0x8] sm:$0xff] %v1390_v18  ;;  %v1389_v20 = vadd.f32 %v1358_v19, %v1147_v17 }
 0x5e7   : > { %1405 = vst [vmem:[#allocation3] sm:$0xff] %v1389_v20 }
 0x5ea   : > { %v1896_v22 = vpop.f32.mrf.mxu1 }
 0x5eb   : > { %v1392_v24 = vadd.f32 %v1896_v22, %v1150_v21 }
 0x5ec   : > { %v1368_v25 = vpop.f32.mrf.mxu1 }
 0x5ed   : > { %1408 = vst [vmem:[#allocation3 + $0x50] sm:$0xff] %v1392_v24  ;;  %v1391_v26 = vadd.f32 %v1368_v25, %v1149_v23 }
 0x5ef   : > { %1407 = vst [vmem:[#allocation3 + $0x60] sm:$0xff] %v1391_v26 }
 0x5f0 PF: > { %s2916_s2 = sld [smem:[#allocation15_spill]]  ;;  %s1425_s9 = sshll.u32 %s2620_s29, 4  ;;  %s2782_s9 = int_to_ptr.vmem [resolvable:$true] %s1425_s9 }
 0x5f1   : > { %s2917_s3 = sld [smem:[#allocation19_spill]]  ;;  %s2791_s21 = scalar_lea.sflag [#allocation6], %s333_s13 }
 0x5f2   : > { %s2918_s7 = sld [smem:[#allocation25_spill]]  ;;  %s2193_s12 = scalar_lea.vmem %s2782_s9, 512 }
 0x5f3   : > { %p2194_p7 = scmp.ne.s32.totalorder %s2782_s9, %s2193_s12 }
 0x5f6   : > { %s1977_s4 = smul.u32 12, %s2916_s2 }
 0x5f7   : > { %p2919_p9 = scmp.ne.s32.totalorder %s2917_s3, 0 }
 0x5f8   : > { %s1422_s27 = sadd.s32 %s2329_s25, %s1977_s4  ;;  %s2350_s25 = smov [#allocation9]  }
 0x5f9   : > { %s1636_s24 = sshll.u32 %s1422_s27, 7  ;;  %p2195_p3 = pnand %p2194_p7, %p2919_p9 }
 0x5fa   : > { %s2787_s6 = scalar_lea.hbm %s2918_s7, %s1636_s24  ;;  %s2197_s26 = sshll.u32 %s2350_s25, 4  ;;  %s2198_s26 = int_to_ptr.vmem [resolvable:$false] %s2197_s26 }
 0x5fb   : > { %p2196_p10 = pneg %p2195_p3  ;;  %s2199_s14 = scalar_lea.vmem %s2198_s26, 1024 }
 0x5fc   : > { %p2200_p0 = scmp.lt.s32.totalorder %s2782_s9, %s2198_s26  ;;  %p2201_p4 = scmp.lt.s32.totalorder %s2199_s14, %s2193_s12 }
 0x5fe   : > { %p2202_p2 = por %p2201_p4, %p2200_p0 }
 0x600   : > { %p2203_p8 = pnand %p2202_p2, %p2196_p10 }
 0x602   : > { %2206 = shalt.err (!%p2203_p8)
}
 0x603   : > { %s2207_s13 = scalar_lea.hbm %s2787_s6, 512  ;;  %s2211_s29 = scalar_lea.hbm %s2918_s7, 3072 }
 0x604   : > { %p2208_p13 = scmp.ne.s32.totalorder %s2787_s6, %s2207_s13  ;;  %p2212_p12 = scmp.lt.s32.totalorder %s2787_s6, %s2918_s7 }
 0x605   : > { %p2213_p5 = scmp.lt.s32.totalorder %s2211_s29, %s2207_s13 }
 0x606   : > { %p2209_p11 = pnand %p2208_p13, %p2919_p9 }
 0x607   : > { %p2214_p1 = por %p2213_p5, %p2212_p12 }
 0x608   : > { %p2210_p6 = pneg %p2209_p11 }
 0x60a   : > { %p2215_p7 = pnand %p2214_p1, %p2210_p6 }
 0x60c   : > { %2218 = shalt.err (!%p2215_p7)
}
 0x60d   : > { %s2351_s2 = smov 128   ;;  %s2352_s4 = smov 384  }
 0x60e   : > { %s2353_s27 = smov 8  }
 0x60f   : > { %1982 = dma.vmem_to_hbm [thread:$0]  (%p2919_p9), %s2782_s9, 512, %s2787_s6, %s2791_s21, %s2351_s2, %s2352_s4, %s2353_s27  }
 0x610 PF: > { %s2920_s24 = sld [smem:[#allocation13_spill]]  ;;  %p1996_p3 = scmp.ge.s32.totalorder %s2341_s28, 2 }
 0x611   : > { %s2921_s11 = sld [smem:[#allocation20_spill]] }
 0x616   : > { %s1440_s10 = sand.u32 1, %s2920_s24  }
 0x617   : > { %p2922_p10 = scmp.ne.s32.totalorder %s2921_s11, 0  ;;  %s1441_s12 = scalar_lea.sflag [#allocation6], %s1440_s10 }
 0x619   : > { %p1992_p0 = pnand %p1996_p3, %p2922_p10 }
 0x61b   : > { %p1993_p4 = pneg %p1992_p0 }
 0x61d   : > { %2284 = dma.done.wait (%p1993_p4), %s1441_s12, 512  }
 0x61e   : > { %2286 = vsyncadd (%p1993_p4), %s1441_s12, 4294966784  ;;  %s23_s28 = sadd.s32 1, %s2341_s28   ;;  %s2924_s3 = sld [smem:[#allocation14_spill]] }
 0x61f   : > { %p2819_p2 = scmp.ge.s32.totalorder %s23_s28, 8   ;;  %s2925_s9 = sld [smem:[#allocation18_spill]] }
 0x620   : > { %s2926_s24 = sld [smem:[#allocation16_spill]]  ;;  %s2930_s15 = smov %s2293_s16 }
 0x621   : > { %s2927_s6 = sld [smem:[#allocation17_spill]]  ;;  %s2931_s16 = smov %s2297_s17 }
 0x622   : > { %s2928_s27 = sld [smem:[#allocation21_spill]]  ;;  %s2932_s17 = smov %s2561_s23 }
 0x623   : > { %s2933_s18 = smov %s2305_s19  ;;  %s2934_s19 = smov %s2309_s20 }
 0x624   : > { %s2935_s20 = smov %s2564_s0  ;;  %s2936_s21 = smov %s2317_s22 }
 0x625   : > { %s2937_s22 = smov %s2924_s3  ;;  %s2938_s23 = smov %s2925_s9 }
 0x626   : > { %s2940_s26 = smov %s2942_s5  ;;  %22 = sbr.rel (!%p2819_p2) target bundleno = 17 (0x11), region = 120 }
 0x627   : > { %s2939_s25 = smov %s2927_s6 }
 0x62b   :  { %1446 = vsyncpa [#allocation5], 1 }
 0x62c   :  { %1448 = vsyncpa [#allocation5 + $0x1], 1 }
 0x62d   :  { %1449 = vsyncpa [#allocation8], 1 }
 0x62e   :  { %1451 = vsyncpa [#allocation8 + $0x1], 1 }
 0x62f   :  { %1452 = vsyncpa [#allocation6], 1 }
 0x630   :  { %1454 = vsyncpa [#allocation6 + $0x1], 1 }

</bundles_post_ra>
